<compile_context>
chip_gen: v7x
topology: tpu7x:2x2x1
jax: 0.10.0
libtpu: 0.0.40
codegen_flags: <defaults>
</compile_context>

<pallas_src>
import functools

import jax
import jax.numpy as jnp
from jax.experimental import pallas as pl
from jax.experimental.pallas import tpu as pltpu


LN_EPS = 1e-5  # nn.LayerNorm default


def _round_up(n, m):
    return ((n + m - 1) // m) * m


def _layernorm(h, gamma, beta):
    # One-pass statistics (E[h], E[h^2]) in f32; clamp guards tiny cancellation.
    mu = jnp.mean(h, axis=-1, keepdims=True)
    ms = jnp.mean(h * h, axis=-1, keepdims=True)
    var = jnp.maximum(ms - mu * mu, 0.0)
    return (h - mu) * jax.lax.rsqrt(var + LN_EPS) * gamma + beta


def projection_head_kernel(x_ref, w1_ref, p1_ref, w2_ref, p2_ref, o_ref,
                           *, gelu_approximate):
    # Linear(input_dim -> hidden_dim): feed the MXU in the stored weight dtype
    # (bf16 x bf16 full-rate path when weights are bf16), f32 accumulate.
    h = jnp.dot(x_ref[...].astype(w1_ref.dtype), w1_ref[...],
                preferred_element_type=jnp.float32)
    p1 = p1_ref[...].astype(jnp.float32)        # rows: [bias, ln_weight, ln_bias]
    h = _layernorm(h + p1[0:1], p1[1:2], p1[2:3])
    # GELU: tanh form (EUP) by default; erf form for bit-exact nn.GELU() parity.
    h = jax.nn.gelu(h, approximate=gelu_approximate)
    # Dropout: eval-mode identity.  TODO(synk): training-mode dropout omitted.

    # Linear(hidden_dim -> output_dim): again feed the MXU in the weight dtype.
    y = jnp.dot(h.astype(w2_ref.dtype), w2_ref[...],
                preferred_element_type=jnp.float32)
    p2 = p2_ref[...].astype(jnp.float32)
    y = _layernorm(y + p2[0:1], p2[1:2], p2[2:3])

    o_ref[...] = y.astype(o_ref.dtype)


_BUFFERED = getattr(pl, "Buffered", None)


def _invariant_spec(shape):
    """Grid-invariant parameter block; single-buffered (never re-DMA'd)."""
    idx = lambda *_: (0,) * len(shape)
    if _BUFFERED is not None:
        try:
            return pl.BlockSpec(shape, idx, pipeline_mode=_BUFFERED(1))
        except TypeError:
            pass
    return pl.BlockSpec(shape, idx)


def _vmem_capacity_bytes():
    try:
        return int(pltpu.get_tpu_info().vmem_capacity_bytes)
    except Exception:
        return 64 << 20  # v7x per-TensorCore VMEM: safe lower bound everywhere


def _auto_tb(B, D_in, H, D_out, x_isz, w_isz, vmem_cap):
    budget = int(0.70 * vmem_cap)
    resident = (D_in * H + H * D_out) * w_isz + 3 * (H + D_out) * 4
    per_row = 2 * (D_in + D_out) * x_isz + 2 * 4 * (H + D_out)
    for cand in (512, 256, 128, 64, 32, 16, 8):
        if resident + cand * per_row <= budget:
            return cand
    return 8  # TODO(synk): K-tiled fallback for weights that overflow VMEM


@functools.partial(jax.jit, static_argnames=("tb", "gelu_approximate"))
def projection_head(x, w1, b1, g1, bt1, w2, b2, g2, bt2, *,
                    tb=None, gelu_approximate=True):
    B, D_in = x.shape
    H = w1.shape[1]
    D_out = w2.shape[1]

    x_isz = jnp.dtype(x.dtype).itemsize
    w1_isz = jnp.dtype(w1.dtype).itemsize
    w2_isz = jnp.dtype(w2.dtype).itemsize

    vmem_cap = _vmem_capacity_bytes()

    # Batch tile: largest MXU-friendly tile that fits the per-chip VMEM budget,
    # clamped (sublane-aligned) so it never exceeds the batch.  No host-side
    # padding: the last grid block may be partial (row-wise math, OOB rows
    # dropped on write).
    if tb is None:
        tb = _auto_tb(B, D_in, H, D_out, x_isz, max(w1_isz, w2_isz), vmem_cap)
    tb = max(8, min(tb, _round_up(B, 8)))
    grid = (pl.cdiv(B, tb),)

    # Pack bias / LN weight / LN bias into one (3, N) array per layer.
    p1 = jnp.concatenate(
        [jnp.reshape(a, (1, -1)) for a in (b1, g1, bt1)], axis=0
    ).astype(jnp.float32)
    p2 = jnp.concatenate(
        [jnp.reshape(a, (1, -1)) for a in (b2, g2, bt2)], axis=0
    ).astype(jnp.float32)

    # VMEM budget: single-buffered weights + double-buffered x / out tiles
    # + f32 intermediates (2x margin), floored at the 32 MiB scoped default
    # and capped below the physical per-core VMEM of this chip generation.
    est = ((D_in * H) * w1_isz + (H * D_out) * w2_isz
           + 3 * (H + D_out) * 4
           + 2 * tb * (D_in + D_out) * x_isz
           + 2 * 4 * tb * (H + D_out))
    vmem_limit = int(min(max(1.25 * est + (4 << 20), 32 << 20),
                         0.85 * vmem_cap))

    cost = pl.CostEstimate(
        flops=2 * B * (D_in * H + H * D_out),
        transcendentals=B * H,  # GELU per hidden element
        bytes_accessed=(x.size * x_isz + w1.size * w1_isz + w2.size * w2_isz
                        + 3 * (H + D_out) * 4 + B * D_out * x_isz),
    )

    return pl.pallas_call(
        functools.partial(projection_head_kernel,
                          gelu_approximate=gelu_approximate),
        out_shape=jax.ShapeDtypeStruct((B, D_out), x.dtype),
        grid_spec=pltpu.PrefetchScalarGridSpec(
            num_scalar_prefetch=0,
            grid=grid,
            in_specs=[
                pl.BlockSpec((tb, D_in), lambda i: (i, 0)),  # x tile (pipelined)
                _invariant_spec((D_in, H)),                  # W1
                _invariant_spec((3, H)),                     # b1 / LN1 gamma / LN1 beta
                _invariant_spec((H, D_out)),                 # W2
                _invariant_spec((3, D_out)),                 # b2 / LN2 gamma / LN2 beta
            ],
            out_specs=pl.BlockSpec((tb, D_out), lambda i: (i, 0)),
        ),
        compiler_params=pltpu.CompilerParams(
            dimension_semantics=("parallel",),
            vmem_limit_bytes=vmem_limit),
        cost_estimate=cost,
    )(x, w1, p1, w2, p2)


def make_params(key, input_dim, hidden_dim, output_dim, dtype=jnp.float32):
    """Deterministic synthetic parameters (shapes match the PyTorch module)."""
    k1, k2, k3, k4 = jax.random.split(key, 4)
    scale1 = 1.0 / jnp.sqrt(input_dim)
    scale2 = 1.0 / jnp.sqrt(hidden_dim)
    w1 = jax.random.uniform(k1, (input_dim, hidden_dim), jnp.float32,
                            -scale1, scale1).astype(dtype)   # [in, out]
    b1 = jax.random.uniform(k2, (1, hidden_dim), jnp.float32, -scale1, scale1)
    g1 = jnp.ones((1, hidden_dim), jnp.float32)               # LayerNorm weight
    bt1 = jnp.zeros((1, hidden_dim), jnp.float32)              # LayerNorm bias
    w2 = jax.random.uniform(k3, (hidden_dim, output_dim), jnp.float32,
                            -scale2, scale2).astype(dtype)
    b2 = jax.random.uniform(k4, (1, output_dim), jnp.float32, -scale2, scale2)
    g2 = jnp.ones((1, output_dim), jnp.float32)
    bt2 = jnp.zeros((1, output_dim), jnp.float32)
    return w1, b1, g1, bt1, w2, b2, g2, bt2


def reference(x, w1, b1, g1, bt1, w2, b2, g2, bt2, *, gelu_approximate=True):
    def ln(h, g, b):
        mu = jnp.mean(h, axis=-1, keepdims=True)
        var = jnp.mean((h - mu) ** 2, axis=-1, keepdims=True)
        return (h - mu) / jnp.sqrt(var + LN_EPS) * g + b
    h = x.astype(jnp.float32) @ w1.astype(jnp.float32) + b1
    h = ln(h, g1, bt1)
    h = jax.nn.gelu(h, approximate=gelu_approximate)
    y = h @ w2.astype(jnp.float32) + b2
    return ln(y, g2, bt2)


if __name__ == "__main__":
    key = jax.random.PRNGKey(0)
    kx, kp, kx2, kp2 = jax.random.split(key, 4)

    # --- main config: lane-dense feature dims (128-multiples) ---
    batch, input_dim, hidden_dim, output_dim = 256, 128, 128, 128
    x = jax.random.normal(kx, (batch, input_dim), jnp.float32)
    params = make_params(kp, input_dim, hidden_dim, output_dim)

    out = jax.block_until_ready(projection_head(x, *params))   # default: tanh GELU
    ref = reference(x, *params, gelu_approximate=True)
    assert out.shape == (batch, output_dim)
    assert jnp.allclose(out, ref, atol=1e-3, rtol=1e-3), "mismatch (128-dim)"

    # --- ragged config: partial last batch block, non-128 feature dims,
    #     exact erf GELU (bit-parity with nn.GELU()) ---
    b_s, in_s, hid_s, out_s = 10, 32, 32, 16
    x_s = jax.random.normal(kx2, (b_s, in_s), jnp.float32)
    params_s = make_params(kp2, in_s, hid_s, out_s)

    out_s_val = jax.block_until_ready(
        projection_head(x_s, *params_s, gelu_approximate=False))
    ref_s = reference(x_s, *params_s, gelu_approximate=False)
    assert out_s_val.shape == (b_s, out_s)
    assert jnp.allclose(out_s_val, ref_s, atol=1e-3, rtol=1e-3), "mismatch (small)"

    print("KERNEL_OK")
</pallas_src>

<mosaic_0001>
module attributes {stable_mosaic.version = 11 : i64} {
  func.func @projection_head_kernel(%arg0: i32, %arg1: memref<256x128xf32, #tpu.memory_space<vmem>>, %arg2: memref<128x128xf32, #tpu.memory_space<vmem>>, %arg3: memref<3x128xf32, #tpu.memory_space<vmem>>, %arg4: memref<128x128xf32, #tpu.memory_space<vmem>>, %arg5: memref<3x128xf32, #tpu.memory_space<vmem>>, %arg6: memref<256x128xf32, #tpu.memory_space<vmem>>) attributes {dimension_semantics = [#tpu.dimension_semantics<parallel>], iteration_bounds = array<i64: 1>, scalar_prefetch = 0 : i64, scratch_operands = 0 : i64, tpu.core_type = #tpu.core_type<tc>, window_params = [{transform_indices = @transform_0, window_bounds = array<i64: 256, 128>}, {pipeline_mode = #tpu.pipeline_mode<synchronous>, transform_indices = @transform_1, window_bounds = array<i64: 128, 128>}, {pipeline_mode = #tpu.pipeline_mode<synchronous>, transform_indices = @transform_2, window_bounds = array<i64: 3, 128>}, {pipeline_mode = #tpu.pipeline_mode<synchronous>, transform_indices = @transform_3, window_bounds = array<i64: 128, 128>}, {pipeline_mode = #tpu.pipeline_mode<synchronous>, transform_indices = @transform_4, window_bounds = array<i64: 3, 128>}, {transform_indices = @transform_5, window_bounds = array<i64: 256, 128>}]} {
    %c0 = arith.constant 0 : index
    %c0_0 = arith.constant 0 : index
    %0 = vector.load %arg1[%c0, %c0_0] : memref<256x128xf32, #tpu.memory_space<vmem>>, vector<256x128xf32>
    %c0_1 = arith.constant 0 : index
    %c0_2 = arith.constant 0 : index
    %1 = vector.load %arg2[%c0_1, %c0_2] : memref<128x128xf32, #tpu.memory_space<vmem>>, vector<128x128xf32>
    %cst = arith.constant dense<0.000000e+00> : vector<256x128xf32>
    %2 = tpu.matmul %0, %1, %cst {dimension_numbers = #tpu.dot_dimension_numbers<[1], [0], [0], [1], [0, 0, 1, 1], [], []>} : vector<256x128xf32>, vector<128x128xf32>, vector<256x128xf32> -> vector<256x128xf32>
    %c0_3 = arith.constant 0 : index
    %c0_4 = arith.constant 0 : index
    %3 = vector.load %arg3[%c0_3, %c0_4] : memref<3x128xf32, #tpu.memory_space<vmem>>, vector<3x128xf32>
    %4 = vector.extract_strided_slice %3 {offsets = [0, 0], sizes = [1, 128], strides = [1, 1]} : vector<3x128xf32> to vector<1x128xf32>
    %5 = vector.broadcast %4 : vector<1x128xf32> to vector<256x128xf32>
    %6 = arith.addf %2, %5 : vector<256x128xf32>
    %7 = vector.extract_strided_slice %3 {offsets = [1, 0], sizes = [1, 128], strides = [1, 1]} : vector<3x128xf32> to vector<1x128xf32>
    %8 = vector.extract_strided_slice %3 {offsets = [2, 0], sizes = [1, 128], strides = [1, 1]} : vector<3x128xf32> to vector<1x128xf32>
    %cst_5 = arith.constant dense<0.000000e+00> : vector<256xf32>
    %9 = vector.multi_reduction <add>, %6, %cst_5 [1] : vector<256x128xf32> to vector<256xf32>
    %10 = vector.shape_cast %9 : vector<256xf32> to vector<256x1xf32>
    %cst_6 = arith.constant 1.280000e+02 : f32
    %11 = vector.broadcast %cst_6 : f32 to vector<256x1xf32>
    %12 = arith.divf %10, %11 : vector<256x1xf32>
    %13 = arith.mulf %6, %6 : vector<256x128xf32>
    %cst_7 = arith.constant dense<0.000000e+00> : vector<256xf32>
    %14 = vector.multi_reduction <add>, %13, %cst_7 [1] : vector<256x128xf32> to vector<256xf32>
    %15 = vector.shape_cast %14 : vector<256xf32> to vector<256x1xf32>
    %cst_8 = arith.constant 1.280000e+02 : f32
    %16 = vector.broadcast %cst_8 : f32 to vector<256x1xf32>
    %17 = arith.divf %15, %16 : vector<256x1xf32>
    %18 = arith.mulf %12, %12 : vector<256x1xf32>
    %19 = arith.subf %17, %18 : vector<256x1xf32>
    %cst_9 = arith.constant 0.000000e+00 : f32
    %20 = vector.broadcast %cst_9 : f32 to vector<256x1xf32>
    %21 = arith.maximumf %19, %20 : vector<256x1xf32>
    %22 = vector.broadcast %12 : vector<256x1xf32> to vector<256x128xf32>
    %23 = arith.subf %6, %22 : vector<256x128xf32>
    %cst_10 = arith.constant 9.99999974E-6 : f32
    %24 = vector.broadcast %cst_10 : f32 to vector<256x1xf32>
    %25 = arith.addf %21, %24 : vector<256x1xf32>
    %26 = math.rsqrt %25 : vector<256x1xf32>
    %27 = vector.broadcast %26 : vector<256x1xf32> to vector<256x128xf32>
    %28 = arith.mulf %23, %27 : vector<256x128xf32>
    %29 = vector.broadcast %7 : vector<1x128xf32> to vector<256x128xf32>
    %30 = arith.mulf %28, %29 : vector<256x128xf32>
    %31 = vector.broadcast %8 : vector<1x128xf32> to vector<256x128xf32>
    %32 = arith.addf %30, %31 : vector<256x128xf32>
    %33 = arith.mulf %32, %32 : vector<256x128xf32>
    %34 = arith.mulf %32, %33 : vector<256x128xf32>
    %cst_11 = arith.constant 4.471500e-02 : f32
    %35 = vector.broadcast %cst_11 : f32 to vector<256x128xf32>
    %36 = arith.mulf %35, %34 : vector<256x128xf32>
    %37 = arith.addf %32, %36 : vector<256x128xf32>
    %cst_12 = arith.constant 0.797884583 : f32
    %38 = vector.broadcast %cst_12 : f32 to vector<256x128xf32>
    %39 = arith.mulf %38, %37 : vector<256x128xf32>
    %40 = math.tanh %39 : vector<256x128xf32>
    %cst_13 = arith.constant 1.000000e+00 : f32
    %41 = vector.broadcast %cst_13 : f32 to vector<256x128xf32>
    %42 = arith.addf %41, %40 : vector<256x128xf32>
    %cst_14 = arith.constant 5.000000e-01 : f32
    %43 = vector.broadcast %cst_14 : f32 to vector<256x128xf32>
    %44 = arith.mulf %43, %42 : vector<256x128xf32>
    %45 = arith.mulf %32, %44 : vector<256x128xf32>
    %c0_15 = arith.constant 0 : index
    %c0_16 = arith.constant 0 : index
    %46 = vector.load %arg4[%c0_15, %c0_16] : memref<128x128xf32, #tpu.memory_space<vmem>>, vector<128x128xf32>
    %cst_17 = arith.constant dense<0.000000e+00> : vector<256x128xf32>
    %47 = tpu.matmul %45, %46, %cst_17 {dimension_numbers = #tpu.dot_dimension_numbers<[1], [0], [0], [1], [0, 0, 1, 1], [], []>} : vector<256x128xf32>, vector<128x128xf32>, vector<256x128xf32> -> vector<256x128xf32>
    %c0_18 = arith.constant 0 : index
    %c0_19 = arith.constant 0 : index
    %48 = vector.load %arg5[%c0_18, %c0_19] : memref<3x128xf32, #tpu.memory_space<vmem>>, vector<3x128xf32>
    %49 = vector.extract_strided_slice %48 {offsets = [0, 0], sizes = [1, 128], strides = [1, 1]} : vector<3x128xf32> to vector<1x128xf32>
    %50 = vector.broadcast %49 : vector<1x128xf32> to vector<256x128xf32>
    %51 = arith.addf %47, %50 : vector<256x128xf32>
    %52 = vector.extract_strided_slice %48 {offsets = [1, 0], sizes = [1, 128], strides = [1, 1]} : vector<3x128xf32> to vector<1x128xf32>
    %53 = vector.extract_strided_slice %48 {offsets = [2, 0], sizes = [1, 128], strides = [1, 1]} : vector<3x128xf32> to vector<1x128xf32>
    %cst_20 = arith.constant dense<0.000000e+00> : vector<256xf32>
    %54 = vector.multi_reduction <add>, %51, %cst_20 [1] : vector<256x128xf32> to vector<256xf32>
    %55 = vector.shape_cast %54 : vector<256xf32> to vector<256x1xf32>
    %cst_21 = arith.constant 1.280000e+02 : f32
    %56 = vector.broadcast %cst_21 : f32 to vector<256x1xf32>
    %57 = arith.divf %55, %56 : vector<256x1xf32>
    %58 = arith.mulf %51, %51 : vector<256x128xf32>
    %cst_22 = arith.constant dense<0.000000e+00> : vector<256xf32>
    %59 = vector.multi_reduction <add>, %58, %cst_22 [1] : vector<256x128xf32> to vector<256xf32>
    %60 = vector.shape_cast %59 : vector<256xf32> to vector<256x1xf32>
    %cst_23 = arith.constant 1.280000e+02 : f32
    %61 = vector.broadcast %cst_23 : f32 to vector<256x1xf32>
    %62 = arith.divf %60, %61 : vector<256x1xf32>
    %63 = arith.mulf %57, %57 : vector<256x1xf32>
    %64 = arith.subf %62, %63 : vector<256x1xf32>
    %cst_24 = arith.constant 0.000000e+00 : f32
    %65 = vector.broadcast %cst_24 : f32 to vector<256x1xf32>
    %66 = arith.maximumf %64, %65 : vector<256x1xf32>
    %67 = vector.broadcast %57 : vector<256x1xf32> to vector<256x128xf32>
    %68 = arith.subf %51, %67 : vector<256x128xf32>
    %cst_25 = arith.constant 9.99999974E-6 : f32
    %69 = vector.broadcast %cst_25 : f32 to vector<256x1xf32>
    %70 = arith.addf %66, %69 : vector<256x1xf32>
    %71 = math.rsqrt %70 : vector<256x1xf32>
    %72 = vector.broadcast %71 : vector<256x1xf32> to vector<256x128xf32>
    %73 = arith.mulf %68, %72 : vector<256x128xf32>
    %74 = vector.broadcast %52 : vector<1x128xf32> to vector<256x128xf32>
    %75 = arith.mulf %73, %74 : vector<256x128xf32>
    %76 = vector.broadcast %53 : vector<1x128xf32> to vector<256x128xf32>
    %77 = arith.addf %75, %76 : vector<256x128xf32>
    %c0_26 = arith.constant 0 : index
    %c0_27 = arith.constant 0 : index
    %78 = vector.load %arg6[%c0_26, %c0_27] : memref<256x128xf32, #tpu.memory_space<vmem>>, vector<256x128xf32>
    tpu.vector_store %arg6[%c0_26, %c0_27], %77 {strides = array<i32>} : memref<256x128xf32, #tpu.memory_space<vmem>>, vector<256x128xf32>,
    return
  }
  func.func @transform_0(%arg0: i32) -> (i32, i32) {
    %c0_i32 = arith.constant 0 : i32
    %c0_i32_0 = arith.constant 0 : i32
    return %arg0, %c0_i32 : i32, i32
  }
  func.func @transform_1(%arg0: i32) -> (i32, i32) {
    %c0_i32 = arith.constant 0 : i32
    %c0_i32_0 = arith.constant 0 : i32
    %c0_i32_1 = arith.constant 0 : i32
    return %c0_i32, %c0_i32_0 : i32, i32
  }
  func.func @transform_2(%arg0: i32) -> (i32, i32) {
    %c0_i32 = arith.constant 0 : i32
    %c0_i32_0 = arith.constant 0 : i32
    %c0_i32_1 = arith.constant 0 : i32
    return %c0_i32, %c0_i32_0 : i32, i32
  }
  func.func @transform_3(%arg0: i32) -> (i32, i32) {
    %c0_i32 = arith.constant 0 : i32
    %c0_i32_0 = arith.constant 0 : i32
    %c0_i32_1 = arith.constant 0 : i32
    return %c0_i32, %c0_i32_0 : i32, i32
  }
  func.func @transform_4(%arg0: i32) -> (i32, i32) {
    %c0_i32 = arith.constant 0 : i32
    %c0_i32_0 = arith.constant 0 : i32
    %c0_i32_1 = arith.constant 0 : i32
    return %c0_i32, %c0_i32_0 : i32, i32
  }
  func.func @transform_5(%arg0: i32) -> (i32, i32) {
    %c0_i32 = arith.constant 0 : i32
    %c0_i32_0 = arith.constant 0 : i32
    return %arg0, %c0_i32 : i32, i32
  }
}

</mosaic_0001>

<bundles_post_ra>
// kernel: projection_head.1
= control target key start
LH: loop header
LB: loop body
LE: loop exit
PB: predicated region body
PF: predicated region fallthrough
CT: control target
= control target key end

     0   :  { %10 = vsyncpa [#allocation3], 0  ;;  %s3895_s0 = inlined_call_operand.hbm [shape: f32[256,128], index: 0, kind: input, shape index: {}]   ;;  %s3896_s1 = inlined_call_operand.hbm [shape: f32[128,128], index: 1, kind: input, shape index: {}]   ;;  %s3897_s2 = inlined_call_operand.vmem [shape: f32[3,128], index: 2, kind: input, shape index: {}]   ;;  %s3898_s3 = inlined_call_operand.hbm [shape: f32[128,128], index: 3, kind: input, shape index: {}]   ;;  %s3899_s4 = inlined_call_operand.vmem [shape: f32[3,128], index: 4, kind: input, shape index: {}]   ;;  %s3900_s5 = inlined_call_operand.hbm [shape: f32[256,128], index: 5, kind: output, shape index: {}]  }
   0x1   :  { %11 = vsyncpa [#allocation6], 0 }
   0x2   :  { %12 = vsyncpa [#allocation4], 0  ;;  %s2577_s18 = smov [#allocation5]   ;;  %s2578_s20 = smov [#allocation2]  }
   0x3   :  { %s30_s19 = sshll.u32 %s2577_s18, 4  ;;  %s18_s21 = sshll.u32 %s2578_s20, 4  ;;  %s31_s19 = int_to_ptr.vmem [resolvable:$true] %s30_s19  ;;  %s2613_s21 = int_to_ptr.vmem [resolvable:$true] %s18_s21 }
   0x4   :  { %s2483_s24 = scalar_lea.hbm %s3896_s1, 2048 }
   0x5   :  { %p2484_p0 = scmp.ne.s32.totalorder %s3896_s1, %s2483_s24  ;;  %p2487_p1 = scmp.lt.u32.totalorder %s2483_s24, %s3896_s1 }
   0x7   :  { %p2489_p2 = pnand %p2487_p1, %p2484_p0 }
   0x9   :  { %2492 = shalt.err (!%p2489_p2)
}
   0xa   :  { %s2493_s29 = scalar_lea.vmem %s31_s19, 2048  ;;  %p2498_p4 = scmp.lt.s32.totalorder %s31_s19, %s31_s19 }
   0xb   :  { %p2494_p3 = scmp.ne.s32.totalorder %s31_s19, %s2493_s29  ;;  %p2499_p5 = scmp.lt.s32.totalorder %s2493_s29, %s2493_s29 }
   0xd   :  { %p2500_p6 = por %p2499_p5, %p2498_p4 }
   0xf   :  { %p2501_p7 = pnand %p2500_p6, %p2494_p3 }
  0x11   :  { %2504 = shalt.err (!%p2501_p7)
}
  0x12   :  { %s2579_s30 = smov 128   ;;  %s2580_s6 = smov 8  }
  0x13   :  { %36 = dma.hbm_to_vmem [thread:$0]  %s3896_s1, 2048, %s31_s19, [#allocation6], %s2579_s30, %s2579_s30, %s2580_s6  }
  0x14   :  { %s2505_s11 = scalar_lea.hbm %s3895_s0, 4096 }
  0x15   :  { %p2506_p8 = scmp.ne.s32.totalorder %s3895_s0, %s2505_s11  ;;  %p2509_p9 = scmp.lt.u32.totalorder %s2505_s11, %s3895_s0 }
  0x17   :  { %p2511_p10 = pnand %p2509_p9, %p2506_p8 }
  0x19   :  { %2514 = shalt.err (!%p2511_p10)
}
  0x1a   :  { %s2515_s16 = scalar_lea.vmem %s2613_s21, 4096  ;;  %p2520_p12 = scmp.lt.s32.totalorder %s2613_s21, %s2613_s21 }
  0x1b   :  { %p2516_p11 = scmp.ne.s32.totalorder %s2613_s21, %s2515_s16  ;;  %p2521_p13 = scmp.lt.s32.totalorder %s2515_s16, %s2515_s16 }
  0x1d   :  { %p2522_p0 = por %p2521_p13, %p2520_p12 }
  0x1f   :  { %p2523_p1 = pnand %p2522_p0, %p2516_p11 }
  0x21   :  { %2526 = shalt.err (!%p2523_p1)
}
  0x22   :  { %24 = dma.hbm_to_vmem [thread:$0]  %s3895_s0, 4096, %s2613_s21, [#allocation3], %s2579_s30, %s2579_s30, %s2580_s6  }
  0x23   :  { %s2581_s18 = smov [#allocation7]   ;;  %s2527_s23 = scalar_lea.hbm %s3898_s3, 2048 }
  0x24   :  { %s44_s19 = sshll.u32 %s2581_s18, 4  ;;  %p2528_p2 = scmp.ne.s32.totalorder %s3898_s3, %s2527_s23  ;;  %s45_s19 = int_to_ptr.vmem [resolvable:$true] %s44_s19 }
  0x25   :  { %p2531_p3 = scmp.lt.u32.totalorder %s2527_s23, %s3898_s3 }
  0x27   :  { %p2533_p4 = pnand %p2531_p3, %p2528_p2 }
  0x29   :  { %2536 = shalt.err (!%p2533_p4)
}
  0x2a   :  { %s2537_s28 = scalar_lea.vmem %s45_s19, 2048  ;;  %p2542_p6 = scmp.lt.s32.totalorder %s45_s19, %s45_s19 }
  0x2b   :  { %p2538_p5 = scmp.ne.s32.totalorder %s45_s19, %s2537_s28  ;;  %p2543_p7 = scmp.lt.s32.totalorder %s2537_s28, %s2537_s28 }
  0x2d   :  { %p2544_p8 = por %p2543_p7, %p2542_p6 }
  0x2f   :  { %p2545_p9 = pnand %p2544_p8, %p2538_p5 }
  0x31   :  { %2548 = shalt.err (!%p2545_p9)
}
  0x32   :  { %50 = dma.hbm_to_vmem [thread:$0]  %s3898_s3, 2048, %s45_s19, [#allocation6], %s2579_s30, %s2579_s30, %s2580_s6  }
  0x33   :  { %2571 = dma.done.wait [#allocation3], 4096  }
  0x34   :  { %2572 = vsyncadd [#allocation3], 4294963200 }
  0x35   :  { %2573 = dma.done.wait [#allocation6], 4096  }
  0x36   :  { %2574 = vsyncadd [#allocation6], 4294963200  ;;  %v94_v0 = vld [vmem:[#allocation5] sm:$0xff]  ;;  %v95_v1 = vld [vmem:[#allocation5 + $0x8] sm:$0xff]  ;;  %v111_v56 = vlaneseq }
  0x37   :  { %v96_v2 = vld [vmem:[#allocation5 + $0x10] sm:$0xff]  ;;  %v2221_v3 = vpack.c.bf16 %v95_v1, %v94_v0  ;;  %v97_v4 = vld [vmem:[#allocation5 + $0x18] sm:$0xff]  ;;  %v98_v6 = vld [vmem:[#allocation5 + $0x20] sm:$0xff] }
  0x38   :  { %v2225_v5 = vpack.c.bf16 %v97_v4, %v96_v2  ;;  %v99_v7 = vld [vmem:[#allocation5 + $0x28] sm:$0xff]  ;;  %v62_v9 = vld [vmem:[#allocation2] sm:$0xff]  ;;  %v100_v10 = vld [vmem:[#allocation5 + $0x30] sm:$0xff]  ;;  %v2665_v57 = vshrl.u32 %v111_v56, 7 }
  0x39   :  { %2222 = vmatprep.subr.bf16.mxu0 %v2221_v3  ;;  %v2229_v8 = vpack.c.bf16 %v99_v7, %v98_v6  ;;  %v101_v11 = vld [vmem:[#allocation5 + $0x38] sm:$0xff]  ;;  %2093 = vmatprep.mubr.f32.mxu0 %v62_v9  ;;  %v102_v13 = vld [vmem:[#allocation5 + $0x40] sm:$0xff]  ;;  %v103_v14 = vld [vmem:[#allocation5 + $0x48] sm:$0xff] }
  0x3a   :  { %2224 = vmatpush3.bf16.msra.mxu0 %v2221_v3  ;;  %v2233_v12 = vpack.c.bf16 %v101_v11, %v100_v10  ;;  %v2237_v15 = vpack.c.bf16 %v103_v14, %v102_v13  ;;  %v104_v16 = vld [vmem:[#allocation5 + $0x50] sm:$0xff]  ;;  %v105_v17 = vld [vmem:[#allocation5 + $0x58] sm:$0xff]  ;;  %v106_v19 = vld [vmem:[#allocation5 + $0x60] sm:$0xff]  ;;  %3908 = vst [vmem:[#allocation12_spill] sm:$0xff] %v2665_v57  ;;  %v3903_v58 = vsub.s32 0, %v2665_v57 }
  0x3b   :  { %2226 = vmatprep.subr.bf16.mxu0 %v2225_v5  ;;  %v2241_v18 = vpack.c.bf16 %v105_v17, %v104_v16  ;;  %v107_v20 = vld [vmem:[#allocation5 + $0x68] sm:$0xff]  ;;  %v108_v22 = vld [vmem:[#allocation5 + $0x70] sm:$0xff]  ;;  %v109_v23 = vld [vmem:[#allocation5 + $0x78] sm:$0xff] }
  0x3c   :  { %v2245_v21 = vpack.c.bf16 %v107_v20, %v106_v19  ;;  %v2249_v24 = vpack.c.bf16 %v109_v23, %v108_v22  ;;  %v63_v25 = vld [vmem:[#allocation2 + $0x8] sm:$0xff]  ;;  %v64_v26 = vld [vmem:[#allocation2 + $0x10] sm:$0xff]  ;;  %v65_v27 = vld [vmem:[#allocation2 + $0x18] sm:$0xff] }
  0x3d   :  { %v66_v28 = vld [vmem:[#allocation2 + $0x20] sm:$0xff]  ;;  %v67_v29 = vld [vmem:[#allocation2 + $0x28] sm:$0xff]  ;;  %v68_v30 = vld [vmem:[#allocation2 + $0x30] sm:$0xff] }
  0x3e   :  { %2228 = vmatpush3.bf16.msra.mxu0 %v2225_v5  ;;  %v69_v31 = vld [vmem:[#allocation2 + $0x38] sm:$0xff]  ;;  %v70_v32 = vld [vmem:[#allocation2 + $0x40] sm:$0xff]  ;;  %v71_v33 = vld [vmem:[#allocation2 + $0x48] sm:$0xff] }
  0x3f   :  { %2230 = vmatprep.subr.bf16.mxu0 %v2229_v8  ;;  %v72_v34 = vld [vmem:[#allocation2 + $0x50] sm:$0xff]  ;;  %v73_v35 = vld [vmem:[#allocation2 + $0x58] sm:$0xff]  ;;  %v74_v36 = vld [vmem:[#allocation2 + $0x60] sm:$0xff] }
  0x40   :  { %v75_v37 = vld [vmem:[#allocation2 + $0x68] sm:$0xff]  ;;  %v76_v38 = vld [vmem:[#allocation2 + $0x70] sm:$0xff]  ;;  %v77_v39 = vld [vmem:[#allocation2 + $0x78] sm:$0xff] }
  0x41   :  { %v78_v40 = vld [vmem:[#allocation2 + $0x80] sm:$0xff]  ;;  %v79_v41 = vld [vmem:[#allocation2 + $0x88] sm:$0xff]  ;;  %v80_v42 = vld [vmem:[#allocation2 + $0x90] sm:$0xff] }
  0x42   :  { %2232 = vmatpush3.bf16.msra.mxu0 %v2229_v8  ;;  %v81_v43 = vld [vmem:[#allocation2 + $0x98] sm:$0xff]  ;;  %v82_v44 = vld [vmem:[#allocation2 + $0xa0] sm:$0xff]  ;;  %v83_v45 = vld [vmem:[#allocation2 + $0xa8] sm:$0xff] }
  0x43   :  { %2234 = vmatprep.subr.bf16.mxu0 %v2233_v12  ;;  %v84_v46 = vld [vmem:[#allocation2 + $0xb0] sm:$0xff]  ;;  %v85_v47 = vld [vmem:[#allocation2 + $0xb8] sm:$0xff]  ;;  %v86_v48 = vld [vmem:[#allocation2 + $0xc0] sm:$0xff] }
  0x44   :  { %v87_v49 = vld [vmem:[#allocation2 + $0xc8] sm:$0xff]  ;;  %v88_v50 = vld [vmem:[#allocation2 + $0xd0] sm:$0xff]  ;;  %v89_v51 = vld [vmem:[#allocation2 + $0xd8] sm:$0xff] }
  0x45   :  { %v90_v52 = vld [vmem:[#allocation2 + $0xe0] sm:$0xff]  ;;  %v91_v53 = vld [vmem:[#allocation2 + $0xe8] sm:$0xff]  ;;  %v92_v54 = vld [vmem:[#allocation2 + $0xf0] sm:$0xff] }
  0x46   :  { %2236 = vmatpush3.bf16.msra.mxu0 %v2233_v12  ;;  %v93_v55 = vld [vmem:[#allocation2 + $0xf8] sm:$0xff]  ;;  %v2671_v59 = vld [vmem:[%s3897_s2] sm:$0x7] }
  0x47   :  { %2238 = vmatprep.subr.bf16.mxu0 %v2237_v15  ;;  %v2676_v60 = vrot.slane %v2671_v59, %v3903_v58  ;;  %v1152_v56 = vld [vmem:[#allocation7 + $0x18] sm:$0xff] }
  0x4a   :  { %2240 = vmatpush3.bf16.msra.mxu0 %v2237_v15 }
  0x4b   :  { %2242 = vmatprep.subr.bf16.mxu0 %v2241_v18 }
  0x4e   :  { %2244 = vmatpush3.bf16.msra.mxu0 %v2241_v18 }
  0x4f   :  { %2246 = vmatprep.subr.bf16.mxu0 %v2245_v21 }
  0x52   :  { %2248 = vmatpush3.bf16.msra.mxu0 %v2245_v21 }
  0x53   :  { %2250 = vmatprep.subr.bf16.mxu0 %v2249_v24 }
  0x56   :  { %2252 = vmatpush3.bf16.msra.mxu0 %v2249_v24 }
  0x59   :  { %2094 = vmatmul.mubr.f32.vlgmr.msra.gmra.mrb[0].mxu0 %v63_v25 }
  0x5a   :  { %2096 = vmatprep.mubr.f32.mxu0 %v64_v26 }
  0x5d   :  { %2097 = vmatmul.mubr.f32.gmra.mrb[2].mxu0 %v65_v27 }
  0x5e   :  { %2099 = vmatprep.mubr.f32.mxu0 %v66_v28 }
  0x61   :  { %2100 = vmatmul.mubr.f32.gmra.mrb[4].mxu0 %v67_v29 }
  0x62   :  { %2102 = vmatprep.mubr.f32.mxu0 %v68_v30 }
  0x65   :  { %2103 = vmatmul.mubr.f32.gmra.mrb[6].mxu0 %v69_v31 }
  0x66   :  { %2105 = vmatprep.mubr.f32.mxu0 %v70_v32 }
  0x69   :  { %2106 = vmatmul.mubr.f32.gmra.mrb[8].mxu0 %v71_v33 }
  0x6a   :  { %2108 = vmatprep.mubr.f32.mxu0 %v72_v34 }
  0x6d   :  { %2109 = vmatmul.mubr.f32.gmra.mrb[10].mxu0 %v73_v35 }
  0x6e   :  { %2111 = vmatprep.mubr.f32.mxu0 %v74_v36 }
  0x71   :  { %2112 = vmatmul.mubr.f32.gmra.mrb[12].mxu0 %v75_v37 }
  0x72   :  { %2114 = vmatprep.mubr.f32.mxu0 %v76_v38 }
  0x75   :  { %2115 = vmatmul.mubr.f32.gmra.mrb[14].mxu0 %v77_v39 }
  0x76   :  { %2117 = vmatprep.mubr.f32.mxu0 %v78_v40 }
  0x79   :  { %2118 = vmatmul.mubr.f32.gmra.mrb[16].mxu0 %v79_v41 }
  0x7a   :  { %2120 = vmatprep.mubr.f32.mxu0 %v80_v42 }
  0x7d   :  { %2121 = vmatmul.mubr.f32.gmra.mrb[18].mxu0 %v81_v43 }
  0x7e   :  { %2123 = vmatprep.mubr.f32.mxu0 %v82_v44 }
  0x81   :  { %2124 = vmatmul.mubr.f32.gmra.mrb[20].mxu0 %v83_v45 }
  0x82   :  { %2126 = vmatprep.mubr.f32.mxu0 %v84_v46 }
  0x85   :  { %2127 = vmatmul.mubr.f32.gmra.mrb[22].mxu0 %v85_v47  ;;  %v1149_v47 = vld [vmem:[#allocation7] sm:$0xff] }
  0x86   :  { %2129 = vmatprep.mubr.f32.mxu0 %v86_v48  ;;  %v1150_v48 = vld [vmem:[#allocation7 + $0x8] sm:$0xff] }
  0x89   :  { %2130 = vmatmul.mubr.f32.gmra.mrb[24].mxu0 %v87_v49 }
  0x8a   :  { %2132 = vmatprep.mubr.f32.mxu0 %v88_v50  ;;  %v2253_v50 = vpack.c.bf16 %v1150_v48, %v1149_v47 }
  0x8c   :  { %2254 = vmatprep.subr.bf16.mxu1 %v2253_v50 }
  0x8d   :  { %2133 = vmatmul.mubr.f32.gmra.mrb[26].mxu0 %v89_v51  ;;  %2256 = vmatpush3.bf16.msra.mxu1 %v2253_v50  ;;  %v1160_v50 = vld [vmem:[#allocation7 + $0x58] sm:$0xff] }
  0x8e   :  { %2135 = vmatprep.mubr.f32.mxu0 %v90_v52 }
  0x91   :  { %2136 = vmatmul.mubr.f32.gmra.mrb[28].mxu0 %v91_v53 }
  0x92   :  { %2138 = vmatprep.mubr.f32.mxu0 %v92_v54 }
  0x95   :  { %2139 = vmatmul.mubr.f32.gmra.mrb[30].mxu0 %v93_v55  ;;  %v1151_v55 = vld [vmem:[#allocation7 + $0x10] sm:$0xff] }
 0x12c   :  { %v2095_v61 = vpop.f32.mrb[0].mxu0 }
 0x12d   :  { %v2679_v62 = vadd.f32 %v2095_v61, %v2676_v60  ;;  %v181_v63 = vpop.f32.mrb[1].mxu0 }
 0x12e   :  { %v2682_v0 = vadd.f32 %v181_v63, %v2676_v60 }
 0x12f   :  { %342 = vadd.xlane.f32.xlu0 %v2679_v62  ;;  %v438_v1 = vmul.f32 %v2679_v62, %v2679_v62 }
 0x130   :  { %v2098_v2 = vpop.f32.mrb[2].mxu0  ;;  %v437_v5 = vmul.f32 %v2682_v0, %v2682_v0 }
 0x131   :  { %471 = vadd.xlane.f32.xlu1 %v438_v1  ;;  %v191_v3 = vpop.f32.mrb[3].mxu0  ;;  %v2694_v7 = vadd.f32 %v2098_v2, %v2676_v60  ;;  %v2257_v1 = vpack.c.bf16 %v1152_v56, %v1151_v55  ;;  %v1161_v55 = vld [vmem:[#allocation7 + $0x60] sm:$0xff]  ;;  %v1162_v56 = vld [vmem:[#allocation7 + $0x68] sm:$0xff] }
 0x132   :  { %v2689_v4 = vadd.f32 %v191_v3, %v2676_v60 }
 0x133   :  { %340 = vadd.xlane.f32.xlu0 %v2682_v0  ;;  %v440_v13 = vmul.f32 %v2694_v7, %v2694_v7  ;;  %2258 = vmatprep.subr.bf16.mxu1 %v2257_v1 }
 0x134   :  { %v2101_v6 = vpop.f32.mrb[4].mxu0  ;;  %v439_v9 = vmul.f32 %v2689_v4, %v2689_v4  ;;  %2260 = vmatpush3.bf16.msra.mxu1 %v2257_v1  ;;  %v1163_v1 = vld [vmem:[#allocation7 + $0x70] sm:$0xff] }
 0x135   :  { %469 = vadd.xlane.f32.xlu1 %v437_v5  ;;  %v201_v8 = vpop.f32.mrb[5].mxu0  ;;  %v2706_v15 = vadd.f32 %v2101_v6, %v2676_v60 }
 0x136   :  { %v2701_v12 = vadd.f32 %v201_v8, %v2676_v60 }
 0x137   :  { %344 = vadd.xlane.f32.xlu0 %v2689_v4  ;;  %v442_v21 = vmul.f32 %v2706_v15, %v2706_v15 }
 0x138   :  { %v2104_v10 = vpop.f32.mrb[6].mxu0  ;;  %v441_v17 = vmul.f32 %v2701_v12, %v2701_v12 }
 0x139   :  { %346 = vadd.xlane.f32.xlu1 %v2694_v7  ;;  %v211_v11 = vpop.f32.mrb[7].mxu0  ;;  %v2718_v23 = vadd.f32 %v2104_v10, %v2676_v60  ;;  %v1154_v10 = vld [vmem:[#allocation7 + $0x28] sm:$0xff] }
 0x13a   :  { %v2713_v20 = vadd.f32 %v211_v11, %v2676_v60 }
 0x13b   :  { %473 = vadd.xlane.f32.xlu0 %v439_v9  ;;  %v444_v29 = vmul.f32 %v2718_v23, %v2718_v23  ;;  %v1153_v9 = vld [vmem:[#allocation7 + $0x20] sm:$0xff] }
 0x13c   :  { %v2107_v14 = vpop.f32.mrb[8].mxu0  ;;  %v443_v25 = vmul.f32 %v2713_v20, %v2713_v20 }
 0x13d   :  { %475 = vadd.xlane.f32.xlu1 %v440_v13  ;;  %v221_v16 = vpop.f32.mrb[9].mxu0  ;;  %v2734_v31 = vadd.f32 %v2107_v14, %v2676_v60  ;;  %v2261_v13 = vpack.c.bf16 %v1154_v10, %v1153_v9 }
 0x13e   :  { %v2729_v28 = vadd.f32 %v221_v16, %v2676_v60 }
 0x13f   :  { %348 = vadd.xlane.f32.xlu0 %v2701_v12  ;;  %v446_v41 = vmul.f32 %v2734_v31, %v2734_v31  ;;  %2262 = vmatprep.subr.bf16.mxu1 %v2261_v13 }
 0x140   :  { %v2110_v18 = vpop.f32.mrb[10].mxu0  ;;  %v445_v35 = vmul.f32 %v2729_v28, %v2729_v28  ;;  %2264 = vmatpush3.bf16.msra.mxu1 %v2261_v13 }
 0x141   :  { %350 = vadd.xlane.f32.xlu1 %v2706_v15  ;;  %v231_v19 = vpop.f32.mrb[11].mxu0  ;;  %v2758_v43 = vadd.f32 %v2110_v18, %v2676_v60 }
 0x142   :  { %v2753_v40 = vadd.f32 %v231_v19, %v2676_v60  ;;  %v1155_v19 = vld [vmem:[#allocation7 + $0x30] sm:$0xff] }
 0x143   :  { %477 = vadd.xlane.f32.xlu0 %v441_v17  ;;  %v448_v63 = vmul.f32 %v2758_v43, %v2758_v43 }
 0x144   :  { %v2113_v22 = vpop.f32.mrb[12].mxu0  ;;  %v447_v49 = vmul.f32 %v2753_v40, %v2753_v40 }
 0x145   :  { %479 = vadd.xlane.f32.xlu1 %v442_v21  ;;  %v241_v24 = vpop.f32.mrb[13].mxu0  ;;  %v2782_v3 = vadd.f32 %v2113_v22, %v2676_v60  ;;  %v1156_v21 = vld [vmem:[#allocation7 + $0x38] sm:$0xff] }
 0x146   :  { %v2777_v61 = vadd.f32 %v241_v24, %v2676_v60 }
 0x147   :  { %352 = vadd.xlane.f32.xlu0 %v2713_v20  ;;  %v450_v24 = vmul.f32 %v2782_v3, %v2782_v3 }
 0x148   :  { %v2723_v26 = vpop.f32.mrb[14].mxu0  ;;  %v449_v11 = vmul.f32 %v2777_v61, %v2777_v61 }
 0x149   :  { %354 = vadd.xlane.f32.xlu1 %v2718_v23  ;;  %v2726_v27 = vpop.f32.mrb[15].mxu0 }
 0x14a   :  { %v2802_v22 = vadd.f32 %v2726_v27, %v2676_v60  ;;  %v1157_v27 = vld [vmem:[#allocation7 + $0x40] sm:$0xff] }
 0x14b   :  { %481 = vadd.xlane.f32.xlu0 %v443_v25  ;;  %v2265_v25 = vpack.c.bf16 %v1156_v21, %v1155_v19 }
 0x14c   :  { %v2119_v30 = vpop.f32.mrb[16].mxu0 }
 0x14d   :  { %483 = vadd.xlane.f32.xlu1 %v444_v29  ;;  %v2737_v32 = vadd.f32 %v2119_v30, %v2676_v60  ;;  %v261_v33 = vpop.f32.mrb[17].mxu0  ;;  %v2808_v30 = vadd.f32 %v2723_v26, %v2676_v60  ;;  %2266 = vmatprep.subr.bf16.mxu1 %v2265_v25 }
 0x14e   :  { %v2740_v34 = vadd.f32 %v261_v33, %v2676_v60  ;;  %2268 = vmatpush3.bf16.msra.mxu1 %v2265_v25 }
 0x14f   :  { %356 = vadd.xlane.f32.xlu0 %v2729_v28 }
 0x150   :  { %v2122_v36 = vpop.f32.mrb[18].mxu0 }
 0x151   :  { %358 = vadd.xlane.f32.xlu1 %v2734_v31  ;;  %v2747_v37 = vadd.f32 %v2122_v36, %v2676_v60  ;;  %v271_v38 = vpop.f32.mrb[19].mxu0 }
 0x152   :  { %v2750_v39 = vadd.f32 %v271_v38, %v2676_v60  ;;  %v1158_v38 = vld [vmem:[#allocation7 + $0x48] sm:$0xff] }
 0x153   :  { %485 = vadd.xlane.f32.xlu0 %v445_v35 }
 0x154   :  { %v2125_v42 = vpop.f32.mrb[20].mxu0  ;;  %v455_v10 = vmul.f32 %v2750_v39, %v2750_v39 }
 0x155   :  { %487 = vadd.xlane.f32.xlu1 %v446_v41  ;;  %v2761_v44 = vadd.f32 %v2125_v42, %v2676_v60  ;;  %v281_v45 = vpop.f32.mrb[21].mxu0  ;;  %v451_v41 = vmul.f32 %v2802_v22, %v2802_v22  ;;  %v2269_v42 = vpack.c.bf16 %v1158_v38, %v1157_v27 }
 0x156   :  { %v2764_v46 = vadd.f32 %v281_v45, %v2676_v60 }
 0x157   :  { %360 = vadd.xlane.f32.xlu0 %v2753_v40  ;;  %2270 = vmatprep.subr.bf16.mxu1 %v2269_v42 }
 0x158   :  { %v2128_v51 = vpop.f32.mrb[22].mxu0  ;;  %2272 = vmatpush3.bf16.msra.mxu1 %v2269_v42  ;;  %v457_v13 = vmul.f32 %v2764_v46, %v2764_v46 }
 0x159   :  { %362 = vadd.xlane.f32.xlu1 %v2758_v43  ;;  %v2771_v52 = vadd.f32 %v2128_v51, %v2676_v60  ;;  %v291_v53 = vpop.f32.mrb[23].mxu0  ;;  %v452_v51 = vmul.f32 %v2808_v30, %v2808_v30 }
 0x15a   :  { %v2774_v54 = vadd.f32 %v291_v53, %v2676_v60 }
 0x15b   :  { %489 = vadd.xlane.f32.xlu0 %v447_v49  ;;  %v1159_v49 = vld [vmem:[#allocation7 + $0x50] sm:$0xff]  ;;  %v460_v19 = vmul.f32 %v2771_v52, %v2771_v52 }
 0x15c   :  { %v2131_v2 = vpop.f32.mrb[24].mxu0  ;;  %v2273_v53 = vpack.c.bf16 %v1160_v50, %v1159_v49 }
 0x15d   :  { %491 = vadd.xlane.f32.xlu1 %v448_v63  ;;  %v2785_v5 = vadd.f32 %v2131_v2, %v2676_v60  ;;  %v301_v6 = vpop.f32.mrb[25].mxu0  ;;  %v453_v63 = vmul.f32 %v2740_v34, %v2740_v34  ;;  %v1164_v2 = vld [vmem:[#allocation7 + $0x78] sm:$0xff] }
 0x15e   :  { %v2788_v8 = vadd.f32 %v301_v6, %v2676_v60  ;;  %2274 = vmatprep.subr.bf16.mxu1 %v2273_v53  ;;  %v454_v6 = vmul.f32 %v2737_v32, %v2737_v32  ;;  %v2281_v9 = vpack.c.bf16 %v1164_v2, %v1163_v1 }
 0x15f   :  { %364 = vadd.xlane.f32.xlu0 %v2777_v61  ;;  %2276 = vmatpush3.bf16.msra.mxu1 %v2273_v53 }
 0x160   :  { %v2134_v14 = vpop.f32.mrb[26].mxu0  ;;  %v461_v21 = vmul.f32 %v2788_v8, %v2788_v8 }
 0x161   :  { %366 = vadd.xlane.f32.xlu1 %v2782_v3  ;;  %v2795_v16 = vadd.f32 %v2134_v14, %v2676_v60  ;;  %v311_v17 = vpop.f32.mrb[27].mxu0  ;;  %v458_v14 = vmul.f32 %v2761_v44, %v2761_v44 }
 0x162   :  { %v2798_v18 = vadd.f32 %v311_v17, %v2676_v60  ;;  %v459_v17 = vmul.f32 %v2774_v54, %v2774_v54 }
 0x163   :  { %493 = vadd.xlane.f32.xlu0 %v449_v11  ;;  %v456_v11 = vmul.f32 %v2747_v37, %v2747_v37 }
 0x164   :  { %v2137_v29 = vpop.f32.mrb[28].mxu0  ;;  %v463_v25 = vmul.f32 %v2798_v18, %v2798_v18 }
 0x165   :  { %495 = vadd.xlane.f32.xlu1 %v450_v24  ;;  %v2811_v33 = vadd.f32 %v2137_v29, %v2676_v60  ;;  %v321_v35 = vpop.f32.mrb[29].mxu0  ;;  %v462_v24 = vmul.f32 %v2785_v5, %v2785_v5  ;;  %v464_v29 = vmul.f32 %v2795_v16, %v2795_v16 }
 0x166   :  { %v2814_v36 = vadd.f32 %v321_v35, %v2676_v60 }
 0x167   :  { %368 = vadd.xlane.f32.xlu0 %v2802_v22  ;;  %v466_v27 = vmul.f32 %v2811_v33, %v2811_v33 }
 0x168   :  { %v2140_v26 = vpop.f32.mrb[30].mxu0  ;;  %v465_v35 = vmul.f32 %v2814_v36, %v2814_v36 }
 0x169   :  { %370 = vadd.xlane.f32.xlu1 %v2808_v30  ;;  %v2821_v45 = vadd.f32 %v2140_v26, %v2676_v60  ;;  %v331_v47 = vpop.f32.mrb[31].mxu0 }
 0x16a   :  { %v2824_v48 = vadd.f32 %v331_v47, %v2676_v60  ;;  %v2277_v60 = vpack.c.bf16 %v1162_v56, %v1161_v55 }
 0x16b   :  { %3909 = vst [vmem:[#allocation13_spill] sm:$0xff] %v2821_v45  ;;  %497 = vadd.xlane.f32.xlu0 %v451_v41  ;;  %v468_v41 = vmul.f32 %v2821_v45, %v2821_v45 }
 0x16c   :  { %2278 = vmatprep.subr.bf16.mxu1 %v2277_v60  ;;  %v467_v38 = vmul.f32 %v2824_v48, %v2824_v48 }
 0x16d   :  { %499 = vadd.xlane.f32.xlu1 %v452_v51  ;;  %2280 = vmatpush3.bf16.msra.mxu1 %v2277_v60 }
 0x16e   :  { %2282 = vmatprep.subr.bf16.mxu1 %v2281_v9 }
 0x16f   :  { %372 = vadd.xlane.f32.xlu0 %v2740_v34 }
 0x171   :  { %374 = vadd.xlane.f32.xlu1 %v2737_v32  ;;  %2284 = vmatpush3.bf16.msra.mxu1 %v2281_v9 }
 0x173   :  { %501 = vadd.xlane.f32.xlu0 %v453_v63 }
 0x175   :  { %503 = vadd.xlane.f32.xlu1 %v454_v6 }
 0x177   :  { %376 = vadd.xlane.f32.xlu0 %v2750_v39 }
 0x179   :  { %378 = vadd.xlane.f32.xlu1 %v2747_v37 }
 0x17b   :  { %505 = vadd.xlane.f32.xlu0 %v455_v10 }
 0x17d   :  { %507 = vadd.xlane.f32.xlu1 %v456_v11 }
 0x17f   :  { %380 = vadd.xlane.f32.xlu0 %v2764_v46 }
 0x181   :  { %382 = vadd.xlane.f32.xlu1 %v2761_v44 }
 0x183   :  { %509 = vadd.xlane.f32.xlu0 %v457_v13 }
 0x185   :  { %511 = vadd.xlane.f32.xlu1 %v458_v14 }
 0x187   :  { %384 = vadd.xlane.f32.xlu0 %v2774_v54 }
 0x189   :  { %386 = vadd.xlane.f32.xlu1 %v2771_v52 }
 0x18b   :  { %513 = vadd.xlane.f32.xlu0 %v459_v17 }
 0x18d   :  { %515 = vadd.xlane.f32.xlu1 %v460_v19 }
 0x18f   :  { %388 = vadd.xlane.f32.xlu0 %v2788_v8 }
 0x191   :  { %390 = vadd.xlane.f32.xlu1 %v2785_v5 }
 0x193   :  { %517 = vadd.xlane.f32.xlu0 %v461_v21 }
 0x195   :  { %519 = vadd.xlane.f32.xlu1 %v462_v24 }
 0x197   :  { %392 = vadd.xlane.f32.xlu0 %v2798_v18 }
 0x199   :  { %394 = vadd.xlane.f32.xlu1 %v2795_v16 }
 0x19b   :  { %521 = vadd.xlane.f32.xlu0 %v463_v25 }
 0x19d   :  { %523 = vadd.xlane.f32.xlu1 %v464_v29 }
 0x19f   :  { %396 = vadd.xlane.f32.xlu0 %v2814_v36 }
 0x1a1   :  { %398 = vadd.xlane.f32.xlu1 %v2811_v33 }
 0x1a3   :  { %525 = vadd.xlane.f32.xlu0 %v465_v35 }
 0x1a5   :  { %527 = vadd.xlane.f32.xlu1 %v466_v27 }
 0x1a7   :  { %400 = vadd.xlane.f32.xlu0 %v2824_v48 }
 0x1a9   :  { %402 = vadd.xlane.f32.xlu1 %v2821_v45 }
 0x1ab   :  { %529 = vadd.xlane.f32.xlu0 %v467_v38  ;;  %v3902_v38 = vsub.s32 1, %v2665_v57 }
 0x1ad   :  { %531 = vadd.xlane.f32.xlu1 %v468_v41 }
 0x1bc   :  { %v343_v42 = vpop.xlane.xlu0 %342 }
 0x1bd   :  { %v406_v26 = vmul.f32 0.0078125, %v343_v42 }
 0x1be   :  { %v472_v47 = vpop.xlane.xlu1 %471 }
 0x1bf   :  { %v566_v49 = vmul.f32 %v406_v26, %v406_v26  ;;  %v534_v50 = vmul.f32 0.0078125, %v472_v47 }
 0x1c0   :  { %v341_v51 = vpop.xlane.xlu0 %340 }
 0x1c1   :  { %v598_v53 = vsub.f32 %v534_v50, %v566_v49  ;;  %v405_v55 = vmul.f32 0.0078125, %v341_v51  ;;  %v3901_v51 = vsub.s32 2, %v2665_v57 }
 0x1c2   :  { %v470_v56 = vpop.xlane.xlu1 %469 }
 0x1c3   :  { %v630_v63 = vmax.f32 %v598_v53, 0.0  ;;  %v565_v60 = vmul.f32 %v405_v55, %v405_v55  ;;  %v533_v1 = vmul.f32 0.0078125, %v470_v56 }
 0x1c4   :  { %v345_v2 = vpop.xlane.xlu0 %344 }
 0x1c5   :  { %v694_v6 = vadd.f32 1e-05, %v630_v63  ;;  %v597_v9 = vsub.f32 %v533_v1, %v565_v60  ;;  %v2876_v10 = vmul.f32 0.0078125, %v345_v2  ;;  %v2893_v60 = vrot.slane %v2671_v59, %v3902_v38 }
 0x1c6   :  { %v347_v11 = vpop.xlane.xlu1 %346  ;;  %v662_v1 = vsub.f32 %v2679_v62, %v406_v26  ;;  %v661_v26 = vsub.f32 %v2682_v0, %v405_v55 }
 0x1c7   :  { %2291 = vrsqrt.f32 %v694_v6  ;;  %v629_v13 = vmax.f32 %v597_v9, 0.0  ;;  %v567_v14 = vmul.f32 %v2876_v10, %v2876_v10  ;;  %v2880_v17 = vmul.f32 0.0078125, %v347_v11 }
 0x1c8   :  { %v474_v19 = vpop.xlane.xlu0 %473 }
 0x1c9   :  { %v693_v21 = vadd.f32 1e-05, %v629_v13  ;;  %v535_v24 = vmul.f32 0.0078125, %v474_v19  ;;  %v568_v29 = vmul.f32 %v2880_v17, %v2880_v17  ;;  %v2901_v19 = vrot.slane %v2671_v59, %v3901_v51 }
 0x1ca   :  { %v476_v25 = vpop.xlane.xlu1 %475 }
 0x1cb   :  { %2293 = vrsqrt.f32 %v693_v21  ;;  %v599_v35 = vsub.f32 %v535_v24, %v567_v14  ;;  %v536_v27 = vmul.f32 0.0078125, %v476_v25 }
 0x1cc   :  { %v349_v41 = vpop.xlane.xlu0 %348 }
 0x1cd   :  { %v631_v42 = vmax.f32 %v599_v35, 0.0  ;;  %v600_v47 = vsub.f32 %v536_v27, %v568_v29  ;;  %v2885_v49 = vmul.f32 0.0078125, %v349_v41 }
 0x1ce   :  { %v351_v50 = vpop.xlane.xlu1 %350 }
 0x1cf   :  { %v695_v53 = vadd.f32 1e-05, %v631_v42  ;;  %v632_v56 = vmax.f32 %v600_v47, 0.0  ;;  %v569_v63 = vmul.f32 %v2885_v49, %v2885_v49  ;;  %v2896_v2 = vmul.f32 0.0078125, %v351_v50 }
 0x1d0   :  { %v478_v6 = vpop.xlane.xlu0 %477 }
 0x1d1   :  { %v2292_v9 = vpop.eup %2291  ;;  %2295 = vrsqrt.f32 %v695_v53  ;;  %v696_v11 = vadd.f32 1e-05, %v632_v56  ;;  %v537_v13 = vmul.f32 0.0078125, %v478_v6  ;;  %v570_v24 = vmul.f32 %v2896_v2, %v2896_v2 }
 0x1d2   :  { %v480_v14 = vpop.xlane.xlu1 %479  ;;  %v758_v21 = vmul.f32 %v2292_v9, %v662_v1 }
 0x1d3   :  { %2297 = vrsqrt.f32 %v696_v11  ;;  %v601_v25 = vsub.f32 %v537_v13, %v569_v63  ;;  %v538_v62 = vmul.f32 0.0078125, %v480_v14  ;;  %v663_v11 = vsub.f32 %v2689_v4, %v2876_v10 }
 0x1d4   :  { %v353_v29 = vpop.xlane.xlu0 %352  ;;  %v794_v35 = vmul.f32 %v2893_v60, %v758_v21  ;;  %v664_v21 = vsub.f32 %v2694_v7, %v2880_v17 }
 0x1d5   :  { %v2294_v27 = vpop.eup %2293  ;;  %v633_v41 = vmax.f32 %v601_v25, 0.0  ;;  %v602_v42 = vsub.f32 %v538_v62, %v570_v24  ;;  %v2907_v47 = vmul.f32 0.0078125, %v353_v29  ;;  %v665_v24 = vsub.f32 %v2701_v12, %v2885_v49 }
 0x1d6   :  { %v355_v50 = vpop.xlane.xlu1 %354  ;;  %v757_v59 = vmul.f32 %v2294_v27, %v661_v26  ;;  %v2910_v53 = vadd.f32 %v2901_v19, %v794_v35  ;;  %v666_v27 = vsub.f32 %v2706_v15, %v2896_v2 }
 0x1d7   :  { %v697_v56 = vadd.f32 1e-05, %v633_v41  ;;  %v634_v1 = vmax.f32 %v602_v42, 0.0  ;;  %v571_v63 = vmul.f32 %v2907_v47, %v2907_v47  ;;  %v2914_v6 = vmul.f32 0.0078125, %v355_v50 }
 0x1d8   :  { %v482_v0 = vpop.xlane.xlu0 %481  ;;  %v793_v55 = vmul.f32 %v2893_v60, %v757_v59  ;;  %v862_v9 = vmul.f32 %v2910_v53, %v2910_v53  ;;  %v667_v42 = vsub.f32 %v2713_v20, %v2907_v47 }
 0x1d9   :  { %2299 = vrsqrt.f32 %v697_v56  ;;  %v698_v13 = vadd.f32 1e-05, %v634_v1  ;;  %v539_v14 = vmul.f32 0.0078125, %v482_v0  ;;  %v572_v4 = vmul.f32 %v2914_v6, %v2914_v6 }
 0x1da   :  { %v484_v25 = vpop.xlane.xlu1 %483  ;;  %v2926_v62 = vadd.f32 %v2901_v19, %v793_v55  ;;  %v894_v26 = vmul.f32 %v862_v9, %v2910_v53  ;;  %v668_v55 = vsub.f32 %v2718_v23, %v2914_v6 }
 0x1db   :  { %v2296_v29 = vpop.eup %2295  ;;  %2301 = vrsqrt.f32 %v698_v13  ;;  %v603_v10 = vsub.f32 %v539_v14, %v571_v63  ;;  %v540_v35 = vmul.f32 0.0078125, %v484_v25 }
 0x1dc   :  { %v357_v7 = vpop.xlane.xlu0 %356  ;;  %v861_v12 = vmul.f32 %v2926_v62, %v2926_v62  ;;  %v926_v17 = vmul.f32 0.044715, %v894_v26  ;;  %v759_v49 = vmul.f32 %v2296_v29, %v663_v11 }
 0x1dd   :  { %v2298_v41 = vpop.eup %2297  ;;  %v635_v50 = vmax.f32 %v603_v10, 0.0  ;;  %v604_v59 = vsub.f32 %v540_v35, %v572_v4  ;;  %v2937_v56 = vmul.f32 0.0078125, %v357_v7 }
 0x1de   :  { %v359_v1 = vpop.xlane.xlu1 %358  ;;  %v893_v63 = vmul.f32 %v861_v12, %v2926_v62  ;;  %v958_v0 = vadd.f32 %v926_v17, %v2910_v53  ;;  %v795_v15 = vmul.f32 %v2893_v60, %v759_v49  ;;  %v760_v2 = vmul.f32 %v2298_v41, %v664_v21 }
 0x1df   :  { %v699_v9 = vadd.f32 1e-05, %v635_v50  ;;  %v636_v11 = vmax.f32 %v604_v59, 0.0  ;;  %v573_v13 = vmul.f32 %v2937_v56, %v2937_v56  ;;  %v2946_v14 = vmul.f32 0.0078125, %v359_v1 }
 0x1e0   :  { %v486_v25 = vpop.xlane.xlu0 %485  ;;  %v925_v26 = vmul.f32 0.044715, %v893_v63  ;;  %v990_v29 = vmul.f32 0.7978846, %v958_v0  ;;  %v2949_v4 = vadd.f32 %v2901_v19, %v795_v15  ;;  %v796_v21 = vmul.f32 %v2893_v60, %v760_v2 }
 0x1e1   :  { %2303 = vrsqrt.f32 %v699_v9  ;;  %v700_v10 = vadd.f32 1e-05, %v636_v11  ;;  %v541_v35 = vmul.f32 0.0078125, %v486_v25  ;;  %v574_v12 = vmul.f32 %v2946_v14, %v2946_v14 }
 0x1e2   :  { %v488_v17 = vpop.xlane.xlu1 %487  ;;  %v957_v49 = vadd.f32 %v925_v26, %v2926_v62  ;;  %2305 = vtanh.f32 %v990_v29  ;;  %v863_v63 = vmul.f32 %v2949_v4, %v2949_v4  ;;  %v2962_v2 = vadd.f32 %v2901_v19, %v796_v21 }
 0x1e3   :  { %v2300_v41 = vpop.eup %2299  ;;  %v605_v59 = vsub.f32 %v541_v35, %v573_v13  ;;  %v542_v1 = vmul.f32 0.0078125, %v488_v17  ;;  %2307 = vrsqrt.f32 %v700_v10 }
 0x1e4   :  { %v361_v0 = vpop.xlane.xlu0 %360  ;;  %v989_v15 = vmul.f32 0.7978846, %v957_v49  ;;  %v761_v9 = vmul.f32 %v2300_v41, %v665_v24  ;;  %v895_v51 = vmul.f32 %v863_v63, %v2949_v4  ;;  %v864_v13 = vmul.f32 %v2962_v2, %v2962_v2 }
 0x1e5   :  { %v2302_v11 = vpop.eup %2301  ;;  %v637_v25 = vmax.f32 %v605_v59, 0.0  ;;  %v606_v26 = vsub.f32 %v542_v1, %v574_v12  ;;  %v2964_v29 = vmul.f32 0.0078125, %v361_v0 }
 0x1e6   :  { %v363_v38 = vpop.xlane.xlu1 %362  ;;  %2309 = vtanh.f32 %v989_v15  ;;  %v797_v10 = vmul.f32 %v2893_v60, %v761_v9  ;;  %v762_v35 = vmul.f32 %v2302_v11, %v666_v27  ;;  %v927_v59 = vmul.f32 0.044715, %v895_v51 }
 0x1e7   :  { %v701_v17 = vadd.f32 1e-05, %v637_v25  ;;  %v638_v49 = vmax.f32 %v606_v26, 0.0  ;;  %v575_v24 = vmul.f32 %v2964_v29, %v2964_v29  ;;  %v2974_v12 = vmul.f32 0.0078125, %v363_v38 }
 0x1e8   :  { %v490_v41 = vpop.xlane.xlu0 %489  ;;  %v896_v1 = vmul.f32 %v864_v13, %v2962_v2  ;;  %v2978_v63 = vadd.f32 %v2901_v19, %v797_v10  ;;  %v798_v15 = vmul.f32 %v2893_v60, %v762_v35  ;;  %v959_v25 = vadd.f32 %v927_v59, %v2949_v4 }
 0x1e9   :  { %2311 = vrsqrt.f32 %v701_v17  ;;  %v702_v0 = vadd.f32 1e-05, %v638_v49  ;;  %v543_v27 = vmul.f32 0.0078125, %v490_v41  ;;  %v576_v9 = vmul.f32 %v2974_v12, %v2974_v12 }
 0x1ea   :  { %v492_v38 = vpop.xlane.xlu1 %491  ;;  %v928_v51 = vmul.f32 0.044715, %v896_v1  ;;  %v865_v17 = vmul.f32 %v2978_v63, %v2978_v63  ;;  %v991_v35 = vmul.f32 0.7978846, %v959_v25  ;;  %v2990_v21 = vadd.f32 %v2901_v19, %v798_v15 }
 0x1eb   :  { %v2304_v26 = vpop.eup %2303  ;;  %2313 = vrsqrt.f32 %v702_v0  ;;  %v607_v13 = vsub.f32 %v543_v27, %v575_v24  ;;  %v544_v10 = vmul.f32 0.0078125, %v492_v38 }
 0x1ec   :  { %v2306_v49 = vpop.eup %2305  ;;  %v365_v41 = vpop.xlane.xlu0 %364  ;;  %v960_v58 = vadd.f32 %v928_v51, %v2962_v2  ;;  %v763_v59 = vmul.f32 %v2304_v26, %v667_v42  ;;  %2315 = vtanh.f32 %v991_v35  ;;  %v897_v25 = vmul.f32 %v865_v17, %v2978_v63 }
 0x1ed   :  { %v639_v1 = vmax.f32 %v607_v13, 0.0  ;;  %v608_v11 = vsub.f32 %v544_v10, %v576_v9  ;;  %v2995_v0 = vmul.f32 0.0078125, %v365_v41  ;;  %v1054_v24 = vadd.f32 1.0, %v2306_v49  ;;  %v2308_v27 = vpop.eup %2307 }
 0x1ee   :  { %v367_v38 = vpop.xlane.xlu1 %366  ;;  %v992_v50 = vmul.f32 0.7978846, %v960_v58  ;;  %v866_v51 = vmul.f32 %v2990_v21, %v2990_v21  ;;  %v929_v58 = vmul.f32 0.044715, %v897_v25  ;;  %v764_v41 = vmul.f32 %v2308_v27, %v668_v55 }
 0x1ef   :  { %v703_v15 = vadd.f32 1e-05, %v639_v1  ;;  %v640_v7 = vmax.f32 %v608_v11, 0.0  ;;  %v577_v20 = vmul.f32 %v2995_v0, %v2995_v0  ;;  %v3004_v9 = vmul.f32 0.0078125, %v367_v38 }
 0x1f0   :  { %v2310_v42 = vpop.eup %2309  ;;  %v494_v26 = vpop.xlane.xlu0 %493  ;;  %v1086_v13 = vmul.f32 0.5, %v1054_v24  ;;  %2317 = vtanh.f32 %v992_v50  ;;  %v961_v38 = vadd.f32 %v929_v58, %v2978_v63 }
 0x1f1   :  { %2319 = vrsqrt.f32 %v703_v15  ;;  %v704_v10 = vadd.f32 1e-05, %v640_v7  ;;  %v545_v17 = vmul.f32 0.0078125, %v494_v26  ;;  %v1053_v49 = vadd.f32 1.0, %v2310_v42 }
 0x1f2   :  { %v578_v11 = vmul.f32 %v3004_v9, %v3004_v9  ;;  %v496_v35 = vpop.xlane.xlu1 %495  ;;  %v1118_v1 = vmul.f32 %v1086_v13, %v2910_v53  ;;  %v993_v7 = vmul.f32 0.7978846, %v961_v38  ;;  %v898_v42 = vmul.f32 %v866_v51, %v2990_v21 }
 0x1f3   :  { %v2312_v47 = vpop.eup %2311  ;;  %2321 = vrsqrt.f32 %v704_v10  ;;  %v609_v24 = vsub.f32 %v545_v17, %v577_v20  ;;  %v546_v50 = vmul.f32 0.0078125, %v496_v35  ;;  %v1085_v25 = vmul.f32 0.5, %v1053_v49 }
 0x1f4   :  { %v369_v15 = vpop.xlane.xlu0 %368  ;;  %v799_v26 = vmul.f32 %v2893_v60, %v763_v59  ;;  %2323 = vtanh.f32 %v993_v7  ;;  %v930_v17 = vmul.f32 0.044715, %v898_v42  ;;  %v800_v59 = vmul.f32 %v2893_v60, %v764_v41 }
 0x1f5   :  { %v3017_v57 = vpop.eup %2313  ;;  %v641_v53 = vmax.f32 %v609_v24, 0.0  ;;  %v610_v13 = vsub.f32 %v546_v50, %v578_v11  ;;  %v3019_v58 = vmul.f32 0.0078125, %v369_v15  ;;  %v1117_v20 = vmul.f32 %v1085_v25, %v2926_v62 }
 0x1f6   :  { %v371_v10 = vpop.xlane.xlu1 %370  ;;  %v3023_v49 = vadd.f32 %v2901_v19, %v799_v26  ;;  %v2316_v55 = vpop.eup %2315  ;;  %v962_v11 = vadd.f32 %v930_v17, %v2990_v21  ;;  %v3036_v41 = vadd.f32 %v2901_v19, %v800_v59 }
 0x1f7   :  { %v705_v51 = vadd.f32 1e-05, %v641_v53  ;;  %v642_v35 = vmax.f32 %v610_v13, 0.0  ;;  %v579_v23 = vmul.f32 %v3019_v58, %v3019_v58  ;;  %2173 = vmatprep.mubr.f32.mxu1 %v1117_v20  ;;  %v3030_v27 = vmul.f32 0.0078125, %v371_v10 }
 0x1f8   :  { %v498_v62 = vpop.xlane.xlu0 %497  ;;  %2174 = vmatmul.mubr.f32.vlgmr.msra.gmra.mrb[0].mxu1 %v1118_v1  ;;  %v867_v38 = vmul.f32 %v3023_v49, %v3023_v49  ;;  %v1055_v25 = vadd.f32 1.0, %v2316_v55  ;;  %v994_v26 = vmul.f32 0.7978846, %v962_v11  ;;  %v868_v55 = vmul.f32 %v3036_v41, %v3036_v41 }
 0x1f9   :  { %2325 = vrsqrt.f32 %v705_v51  ;;  %v706_v24 = vadd.f32 1e-05, %v642_v35  ;;  %v547_v50 = vmul.f32 0.0078125, %v498_v62  ;;  %v580_v7 = vmul.f32 %v3030_v27, %v3030_v27 }
 0x1fa   :  { %v2318_v15 = vpop.eup %2317  ;;  %v500_v1 = vpop.xlane.xlu1 %499  ;;  %v899_v53 = vmul.f32 %v867_v38, %v3023_v49  ;;  %v1087_v17 = vmul.f32 0.5, %v1055_v25  ;;  %v3910_v25 = vsub.f32 %v2729_v28, %v2937_v56 }
 0x1fb   :  { %v2320_v13 = vpop.eup %2319  ;;  %2327 = vrsqrt.f32 %v706_v24  ;;  %v611_v20 = vsub.f32 %v547_v50, %v579_v23  ;;  %v548_v10 = vmul.f32 0.0078125, %v500_v1  ;;  %v1056_v51 = vadd.f32 1.0, %v2318_v15 }
 0x1fc   :  { %v373_v59 = vpop.xlane.xlu0 %372  ;;  %2329 = vtanh.f32 %v994_v26  ;;  %v931_v35 = vmul.f32 0.044715, %v899_v53  ;;  %v1119_v11 = vmul.f32 %v1087_v17, %v2949_v4  ;;  %v900_v50 = vmul.f32 %v868_v55, %v3036_v41 }
 0x1fd   :  { %v3045_v62 = vpop.eup %2321  ;;  %v643_v6 = vmax.f32 %v611_v20, 0.0  ;;  %v612_v42 = vsub.f32 %v548_v10, %v580_v7  ;;  %v3047_v45 = vmul.f32 0.0078125, %v373_v59  ;;  %v1088_v24 = vmul.f32 0.5, %v1056_v51 }
 0x1fe   :  { %v375_v38 = vpop.xlane.xlu1 %374  ;;  %v963_v23 = vadd.f32 %v931_v35, %v3023_v49  ;;  %v765_v15 = vmul.f32 %v2312_v47, %v3910_v25  ;;  %2176 = vmatprep.mubr.f32.mxu1 %v1119_v11  ;;  %v2324_v4 = vpop.eup %2323  ;;  %v932_v51 = vmul.f32 0.044715, %v900_v50 }
 0x1ff   :  { %v707_v1 = vadd.f32 1e-05, %v643_v6  ;;  %v644_v26 = vmax.f32 %v612_v42, 0.0  ;;  %v581_v53 = vmul.f32 %v3047_v45, %v3047_v45  ;;  %v677_v7 = vsub.f32 %v2740_v34, %v3047_v45 }
 0x200   :  { %v3059_v20 = vmul.f32 0.0078125, %v375_v38  ;;  %v1120_v10 = vmul.f32 %v1088_v24, %v2962_v2  ;;  %v502_v17 = vpop.xlane.xlu0 %501  ;;  %v995_v59 = vmul.f32 0.7978846, %v963_v23  ;;  %v1057_v47 = vadd.f32 1.0, %v2324_v4 }
 0x201   :  { %2331 = vrsqrt.f32 %v707_v1  ;;  %v708_v28 = vadd.f32 1e-05, %v644_v26  ;;  %v549_v56 = vmul.f32 0.0078125, %v502_v17  ;;  %v964_v55 = vadd.f32 %v932_v51, %v3036_v41 }
 0x202   :  { %v582_v6 = vmul.f32 %v3059_v20, %v3059_v20  ;;  %v678_v42 = vsub.f32 %v2737_v32, %v3059_v20  ;;  %2177 = vmatmul.mubr.f32.gmra.mrb[2].mxu1 %v1120_v10  ;;  %v504_v35 = vpop.xlane.xlu1 %503  ;;  %2333 = vtanh.f32 %v995_v59  ;;  %v1089_v24 = vmul.f32 0.5, %v1057_v47 }
 0x203   :  { %v3067_v11 = vpop.eup %2325  ;;  %2335 = vrsqrt.f32 %v708_v28  ;;  %v613_v2 = vsub.f32 %v549_v56, %v581_v53  ;;  %v550_v38 = vmul.f32 0.0078125, %v504_v35  ;;  %v996_v50 = vmul.f32 0.7978846, %v964_v55 }
 0x204   :  { %v377_v23 = vpop.xlane.xlu0 %376  ;;  %v801_v25 = vmul.f32 %v2893_v60, %v765_v15  ;;  %v3911_v1 = vsub.f32 %v2734_v31, %v2946_v14  ;;  %v3912_v4 = vsub.f32 %v2753_v40, %v2964_v29  ;;  %v1121_v28 = vmul.f32 %v1089_v24, %v2978_v63 }
 0x205   :  { %v3077_v17 = vpop.eup %2327  ;;  %v645_v59 = vmax.f32 %v613_v2, 0.0  ;;  %v614_v51 = vsub.f32 %v550_v38, %v582_v6  ;;  %v3079_v53 = vmul.f32 0.0078125, %v377_v23  ;;  %2337 = vtanh.f32 %v996_v50 }
 0x206   :  { %v766_v26 = vmul.f32 %v3017_v57, %v3911_v1  ;;  %v767_v10 = vmul.f32 %v2320_v13, %v3912_v4  ;;  %v2330_v56 = vpop.eup %2329  ;;  %v379_v47 = vpop.xlane.xlu1 %378  ;;  %v3083_v15 = vadd.f32 %v2901_v19, %v801_v25  ;;  %2179 = vmatprep.mubr.f32.mxu1 %v1121_v28 }
 0x207   :  { %v709_v40 = vadd.f32 1e-05, %v645_v59  ;;  %v646_v14 = vmax.f32 %v614_v51, 0.0  ;;  %v583_v29 = vmul.f32 %v3079_v53, %v3079_v53  ;;  %v679_v13 = vsub.f32 %v2750_v39, %v3079_v53 }
 0x208   :  { %v802_v57 = vmul.f32 %v2893_v60, %v766_v26  ;;  %v803_v31 = vmul.f32 %v2893_v60, %v767_v10  ;;  %v3091_v63 = vmul.f32 0.0078125, %v379_v47  ;;  %v1058_v6 = vadd.f32 1.0, %v2330_v56  ;;  %v506_v35 = vpop.xlane.xlu0 %505 }
 0x209   :  { %v869_v55 = vmul.f32 %v3083_v15, %v3083_v15  ;;  %2339 = vrsqrt.f32 %v709_v40  ;;  %v710_v38 = vadd.f32 1e-05, %v646_v14  ;;  %v551_v24 = vmul.f32 0.0078125, %v506_v35 }
 0x20a   :  { %v3096_v2 = vadd.f32 %v2901_v19, %v802_v57  ;;  %v3099_v23 = vadd.f32 %v2901_v19, %v803_v31  ;;  %v584_v50 = vmul.f32 %v3091_v63, %v3091_v63  ;;  %v1090_v1 = vmul.f32 0.5, %v1058_v6  ;;  %v508_v26 = vpop.xlane.xlu1 %507 }
 0x20b   :  { %v901_v4 = vmul.f32 %v869_v55, %v3083_v15  ;;  %v2332_v10 = vpop.eup %2331  ;;  %2341 = vrsqrt.f32 %v710_v38  ;;  %v615_v59 = vsub.f32 %v551_v24, %v583_v29  ;;  %v552_v51 = vmul.f32 0.0078125, %v508_v26 }
 0x20c   :  { %v870_v28 = vmul.f32 %v3096_v2, %v3096_v2  ;;  %v2334_v56 = vpop.eup %2333  ;;  %v3913_v47 = vsub.f32 %v2802_v22, %v3019_v58  ;;  %v1122_v31 = vmul.f32 %v1090_v1, %v2990_v21  ;;  %v381_v40 = vpop.xlane.xlu0 %380  ;;  %v871_v6 = vmul.f32 %v3099_v23, %v3099_v23 }
 0x20d   :  { %v933_v14 = vmul.f32 0.044715, %v901_v4  ;;  %v2336_v35 = vpop.eup %2335  ;;  %v647_v55 = vmax.f32 %v615_v59, 0.0  ;;  %v616_v29 = vsub.f32 %v552_v51, %v584_v50  ;;  %v3116_v38 = vmul.f32 0.0078125, %v381_v40 }
 0x20e   :  { %v3111_v57 = vmul.f32 %v2332_v10, %v3913_v47  ;;  %v1059_v24 = vadd.f32 1.0, %v2334_v56  ;;  %v3914_v26 = vsub.f32 %v2808_v30, %v3030_v27  ;;  %2180 = vmatmul.mubr.f32.gmra.mrb[4].mxu1 %v1122_v31  ;;  %v383_v22 = vpop.xlane.xlu1 %382  ;;  %v902_v58 = vmul.f32 %v870_v28, %v3096_v2 }
 0x20f   :  { %v965_v21 = vadd.f32 %v933_v14, %v3083_v15  ;;  %v903_v1 = vmul.f32 %v871_v6, %v3099_v23  ;;  %v711_v4 = vadd.f32 1e-05, %v647_v55  ;;  %v648_v10 = vmax.f32 %v616_v29, 0.0  ;;  %v2338_v51 = vpop.eup %2337 }
 0x210   :  { %v3121_v25 = vmul.f32 %v2336_v35, %v3914_v26  ;;  %v585_v50 = vmul.f32 %v3116_v38, %v3116_v38  ;;  %v681_v59 = vsub.f32 %v2764_v46, %v3116_v38  ;;  %v1091_v30 = vmul.f32 0.5, %v1059_v24  ;;  %v510_v56 = vpop.xlane.xlu0 %509 }
 0x211   :  { %v3130_v27 = vmul.f32 0.0078125, %v383_v22  ;;  %v997_v47 = vmul.f32 0.7978846, %v965_v21  ;;  %v934_v31 = vmul.f32 0.044715, %v902_v58  ;;  %2343 = vrsqrt.f32 %v711_v4 }
 0x212   :  { %v712_v40 = vadd.f32 1e-05, %v648_v10  ;;  %v1060_v28 = vadd.f32 1.0, %v2338_v51  ;;  %v553_v14 = vmul.f32 0.0078125, %v510_v56  ;;  %v1123_v6 = vmul.f32 %v1091_v30, %v3023_v49  ;;  %v512_v29 = vpop.xlane.xlu1 %511 }
 0x213   :  { %v586_v35 = vmul.f32 %v3130_v27, %v3130_v27  ;;  %v682_v55 = vsub.f32 %v2761_v44, %v3130_v27  ;;  %2345 = vtanh.f32 %v997_v47  ;;  %v2340_v24 = vpop.eup %2339  ;;  %v554_v21 = vmul.f32 0.0078125, %v512_v29 }
 0x214   :  { %2347 = vrsqrt.f32 %v712_v40  ;;  %v1092_v26 = vmul.f32 0.5, %v1060_v28  ;;  %v617_v22 = vsub.f32 %v553_v14, %v585_v50  ;;  %v3140_v58 = vmul.f32 %v2340_v24, %v677_v7  ;;  %2182 = vmatprep.mubr.f32.mxu1 %v1123_v6  ;;  %v385_v49 = vpop.xlane.xlu0 %384 }
 0x215   :  { %v966_v4 = vadd.f32 %v934_v31, %v3096_v2  ;;  %v935_v10 = vmul.f32 0.044715, %v903_v1  ;;  %v3915_v51 = vsub.f32 %v2758_v43, %v2974_v12  ;;  %v2342_v56 = vpop.eup %2341  ;;  %v618_v40 = vsub.f32 %v554_v21, %v586_v35 }
 0x216   :  { %v1124_v47 = vmul.f32 %v1092_v26, %v3036_v41  ;;  %v649_v50 = vmax.f32 %v617_v22, 0.0  ;;  %v3148_v28 = vmul.f32 0.0078125, %v385_v49  ;;  %v3153_v34 = vmul.f32 %v2342_v56, %v678_v42  ;;  %v387_v45 = vpop.xlane.xlu1 %386 }
 0x217   :  { %v768_v30 = vmul.f32 %v3045_v62, %v3915_v51  ;;  %v998_v7 = vmul.f32 0.7978846, %v966_v4  ;;  %v967_v1 = vadd.f32 %v935_v10, %v3099_v23  ;;  %v650_v62 = vmax.f32 %v618_v40, 0.0 }
 0x218   :  { %2183 = vmatmul.mubr.f32.gmra.mrb[6].mxu1 %v1124_v47  ;;  %v713_v12 = vadd.f32 1e-05, %v649_v50  ;;  %v587_v41 = vmul.f32 %v3148_v28, %v3148_v28  ;;  %v683_v31 = vsub.f32 %v2774_v54, %v3148_v28  ;;  %v3161_v14 = vmul.f32 0.0078125, %v387_v45  ;;  %v514_v32 = vpop.xlane.xlu0 %513 }
 0x219   :  { %v804_v43 = vmul.f32 %v2893_v60, %v768_v30  ;;  %2349 = vtanh.f32 %v998_v7  ;;  %v999_v20 = vmul.f32 0.7978846, %v967_v1  ;;  %v714_v6 = vadd.f32 1e-05, %v650_v62 }
 0x21a   :  { %2351 = vrsqrt.f32 %v713_v12  ;;  %v555_v35 = vmul.f32 0.0078125, %v514_v32  ;;  %v3916_v29 = vsub.f32 %v2777_v61, %v2995_v0  ;;  %v588_v26 = vmul.f32 %v3161_v14, %v3161_v14  ;;  %v516_v21 = vpop.xlane.xlu1 %515 }
 0x21b   :  { %v3164_v42 = vadd.f32 %v2901_v19, %v804_v43  ;;  %v684_v22 = vsub.f32 %v2771_v52, %v3161_v14  ;;  %2353 = vtanh.f32 %v999_v20  ;;  %v2344_v4 = vpop.eup %2343  ;;  %v556_v51 = vmul.f32 0.0078125, %v516_v21 }
 0x21c   :  { %v769_v24 = vmul.f32 %v3067_v11, %v3916_v29  ;;  %2355 = vrsqrt.f32 %v714_v6  ;;  %v619_v10 = vsub.f32 %v555_v35, %v587_v41  ;;  %v3180_v0 = vmul.f32 %v2344_v4, %v679_v13  ;;  %v389_v11 = vpop.xlane.xlu0 %388 }
 0x21d   :  { %v872_v49 = vmul.f32 %v3164_v42, %v3164_v42  ;;  %v2346_v61 = vpop.eup %2345  ;;  %v3917_v47 = vsub.f32 %v2782_v3, %v3004_v9  ;;  %v3189_v40 = vmul.f32 %v2893_v60, %v3111_v57  ;;  %v620_v43 = vsub.f32 %v556_v51, %v588_v26 }
 0x21e   :  { %v805_v30 = vmul.f32 %v2893_v60, %v769_v24  ;;  %v2348_v45 = vpop.eup %2347  ;;  %v1061_v7 = vadd.f32 1.0, %v2346_v61  ;;  %v651_v1 = vmax.f32 %v619_v10, 0.0  ;;  %v3191_v12 = vmul.f32 0.0078125, %v389_v11  ;;  %v391_v13 = vpop.xlane.xlu1 %390 }
 0x21f   :  { %v904_v56 = vmul.f32 %v872_v49, %v3164_v42  ;;  %v770_v50 = vmul.f32 %v3077_v17, %v3917_v47  ;;  %v3918_v39 = vsub.f32 %v2747_v37, %v3091_v63  ;;  %v652_v41 = vmax.f32 %v620_v43, 0.0 }
 0x220   :  { %v3199_v3 = vadd.f32 %v2901_v19, %v805_v30  ;;  %v1093_v17 = vmul.f32 0.5, %v1061_v7  ;;  %v715_v57 = vadd.f32 1e-05, %v651_v1  ;;  %v589_v32 = vmul.f32 %v3191_v12, %v3191_v12  ;;  %v518_v63 = vpop.xlane.xlu0 %517 }
 0x221   :  { %v3196_v53 = vmul.f32 %v2348_v45, %v3918_v39  ;;  %v936_v62 = vmul.f32 0.044715, %v904_v56  ;;  %v806_v9 = vmul.f32 %v2893_v60, %v770_v50  ;;  %v685_v20 = vsub.f32 %v2788_v8, %v3191_v12 }
 0x222   :  { %v3206_v6 = vmul.f32 0.0078125, %v391_v13  ;;  %v873_v35 = vmul.f32 %v3199_v3, %v3199_v3  ;;  %v1125_v29 = vmul.f32 %v1093_v17, %v3083_v15  ;;  %2357 = vrsqrt.f32 %v715_v57  ;;  %v520_v51 = vpop.xlane.xlu1 %519 }
 0x223   :  { %v968_v37 = vadd.f32 %v936_v62, %v3164_v42  ;;  %v716_v24 = vadd.f32 1e-05, %v652_v41  ;;  %v557_v26 = vmul.f32 0.0078125, %v518_v63  ;;  %v2350_v21 = vpop.eup %2349  ;;  %v558_v15 = vmul.f32 0.0078125, %v520_v51 }
 0x224   :  { %v590_v49 = vmul.f32 %v3206_v6, %v3206_v6  ;;  %v686_v4 = vsub.f32 %v2785_v5, %v3206_v6  ;;  %v905_v30 = vmul.f32 %v873_v35, %v3199_v3  ;;  %v2352_v61 = vpop.eup %2351  ;;  %2185 = vmatprep.mubr.f32.mxu1 %v1125_v29  ;;  %v1062_v11 = vadd.f32 1.0, %v2350_v21  ;;  %v393_v45 = vpop.xlane.xlu0 %392 }
 0x225   :  { %v1000_v10 = vmul.f32 0.7978846, %v968_v37  ;;  %2359 = vrsqrt.f32 %v716_v24  ;;  %v621_v56 = vsub.f32 %v557_v26, %v589_v32  ;;  %v2354_v47 = vpop.eup %2353  ;;  %v3220_v50 = vmul.f32 %v2352_v61, %v681_v59 }
 0x226   :  { %v937_v7 = vmul.f32 0.044715, %v905_v30  ;;  %v3223_v1 = vadd.f32 %v2901_v19, %v806_v9  ;;  %v2356_v43 = vpop.eup %2355  ;;  %v1094_v39 = vmul.f32 0.5, %v1062_v11  ;;  %v1063_v13 = vadd.f32 1.0, %v2354_v47  ;;  %v395_v38 = vpop.xlane.xlu1 %394 }
 0x227   :  { %2361 = vtanh.f32 %v1000_v10  ;;  %v653_v62 = vmax.f32 %v621_v56, 0.0  ;;  %v622_v17 = vsub.f32 %v558_v15, %v590_v49  ;;  %v3228_v57 = vmul.f32 %v2356_v43, %v682_v55 }
 0x228   :  { %v3230_v41 = vmul.f32 0.0078125, %v393_v45  ;;  %v969_v46 = vadd.f32 %v937_v7, %v3199_v3  ;;  %v874_v59 = vmul.f32 %v3223_v1, %v3223_v1  ;;  %v1126_v9 = vmul.f32 %v1094_v39, %v3096_v2  ;;  %v522_v29 = vpop.xlane.xlu0 %521 }
 0x229   :  { %v1095_v32 = vmul.f32 0.5, %v1063_v13  ;;  %v717_v37 = vadd.f32 1e-05, %v653_v62  ;;  %v654_v63 = vmax.f32 %v622_v17, 0.0  ;;  %v3240_v55 = vmul.f32 0.0078125, %v395_v38 }
 0x22a   :  { %v591_v35 = vmul.f32 %v3230_v41, %v3230_v41  ;;  %v687_v44 = vsub.f32 %v2798_v18, %v3230_v41  ;;  %v1001_v27 = vmul.f32 0.7978846, %v969_v46  ;;  %2186 = vmatmul.mubr.f32.gmra.mrb[8].mxu1 %v1126_v9  ;;  %v906_v2 = vmul.f32 %v874_v59, %v3223_v1  ;;  %v524_v51 = vpop.xlane.xlu1 %523 }
 0x22b   :  { %v1127_v24 = vmul.f32 %v1095_v32, %v3099_v23  ;;  %2363 = vrsqrt.f32 %v717_v37  ;;  %v718_v26 = vadd.f32 1e-05, %v654_v63  ;;  %v592_v21 = vmul.f32 %v3240_v55, %v3240_v55 }
 0x22c   :  { %2365 = vtanh.f32 %v1001_v27  ;;  %v688_v49 = vsub.f32 %v2795_v16, %v3240_v55  ;;  %v559_v10 = vmul.f32 0.0078125, %v522_v29  ;;  %v2358_v30 = vpop.eup %2357  ;;  %v938_v61 = vmul.f32 0.044715, %v906_v2  ;;  %v397_v47 = vpop.xlane.xlu0 %396 }
 0x22d   :  { %2188 = vmatprep.mubr.f32.mxu1 %v1127_v24  ;;  %2367 = vrsqrt.f32 %v718_v26  ;;  %v560_v11 = vmul.f32 0.0078125, %v524_v51  ;;  %v3250_v23 = vadd.f32 %v2901_v19, %v3189_v40  ;;  %v3255_v56 = vmul.f32 %v2358_v30, %v683_v31 }
 0x22e   :  { %v623_v15 = vsub.f32 %v559_v10, %v591_v35  ;;  %v808_v45 = vmul.f32 %v2893_v60, %v3121_v25  ;;  %v809_v7 = vmul.f32 %v2893_v60, %v3140_v58  ;;  %v970_v39 = vadd.f32 %v938_v61, %v3223_v1  ;;  %v399_v25 = vpop.xlane.xlu1 %398 }
 0x22f   :  { %v2360_v43 = vpop.eup %2359  ;;  %v624_v13 = vsub.f32 %v560_v11, %v592_v21  ;;  %v3262_v62 = vmul.f32 0.0078125, %v397_v47  ;;  %v875_v40 = vmul.f32 %v3250_v23, %v3250_v23  ;;  %v811_v18 = vmul.f32 %v2893_v60, %v3180_v0 }
 0x230   :  { %v3269_v28 = vmul.f32 %v2360_v43, %v684_v22  ;;  %v655_v31 = vmax.f32 %v623_v15, 0.0  ;;  %v3272_v17 = vadd.f32 %v2901_v19, %v808_v45  ;;  %v3275_v58 = vadd.f32 %v2901_v19, %v809_v7  ;;  %v526_v37 = vpop.xlane.xlu0 %525 }
 0x231   :  { %v2362_v54 = vpop.eup %2361  ;;  %v1002_v38 = vmul.f32 0.7978846, %v970_v39  ;;  %v656_v59 = vmax.f32 %v624_v13, 0.0  ;;  %v593_v9 = vmul.f32 %v3262_v62, %v3262_v62  ;;  %v689_v52 = vsub.f32 %v2814_v36, %v3262_v62 }
 0x232   :  { %v1064_v46 = vadd.f32 1.0, %v2362_v54  ;;  %v719_v32 = vadd.f32 1e-05, %v655_v31  ;;  %v907_v14 = vmul.f32 %v875_v40, %v3250_v23  ;;  %v3282_v22 = vmul.f32 0.0078125, %v399_v25  ;;  %v528_v2 = vpop.xlane.xlu1 %527 }
 0x233   :  { %2369 = vtanh.f32 %v1002_v38  ;;  %v720_v35 = vadd.f32 1e-05, %v656_v59  ;;  %v876_v27 = vmul.f32 %v3272_v17, %v3272_v17  ;;  %v561_v30 = vmul.f32 0.0078125, %v526_v37 }
 0x234   :  { %v1096_v63 = vmul.f32 0.5, %v1064_v46  ;;  %2371 = vrsqrt.f32 %v719_v32  ;;  %v939_v29 = vmul.f32 0.044715, %v907_v14  ;;  %v594_v24 = vmul.f32 %v3282_v22, %v3282_v22  ;;  %v401_v45 = vpop.xlane.xlu0 %400 }
 0x235   :  { %v690_v26 = vsub.f32 %v2811_v33, %v3282_v22  ;;  %v2364_v21 = vpop.eup %2363  ;;  %2373 = vrsqrt.f32 %v720_v35  ;;  %v908_v51 = vmul.f32 %v876_v27, %v3272_v17  ;;  %v562_v47 = vmul.f32 0.0078125, %v528_v2 }
 0x236   :  { %v1128_v10 = vmul.f32 %v1096_v63, %v3164_v42  ;;  %v2366_v61 = vpop.eup %2365  ;;  %v3295_v11 = vmul.f32 %v2364_v21, %v685_v20  ;;  %v971_v15 = vadd.f32 %v939_v29, %v3250_v23  ;;  %v877_v7 = vmul.f32 %v3275_v58, %v3275_v58  ;;  %v403_v31 = vpop.xlane.xlu1 %402 }
 0x237   :  { %v2368_v43 = vpop.eup %2367  ;;  %v1065_v42 = vadd.f32 1.0, %v2366_v61  ;;  %v940_v39 = vmul.f32 0.044715, %v908_v51  ;;  %v625_v13 = vsub.f32 %v561_v30, %v593_v9  ;;  %v3300_v40 = vmul.f32 0.0078125, %v401_v45 }
 0x238   :  { %2189 = vmatmul.mubr.f32.gmra.mrb[10].mxu1 %v1128_v10  ;;  %v3305_v8 = vmul.f32 %v2368_v43, %v686_v4  ;;  %v1003_v12 = vmul.f32 0.7978846, %v971_v15  ;;  %v626_v20 = vsub.f32 %v562_v47, %v594_v24  ;;  %v909_v54 = vmul.f32 %v877_v7, %v3275_v58  ;;  %v530_v6 = vpop.xlane.xlu0 %529 }
 0x239   :  { %v1097_v25 = vmul.f32 0.5, %v1065_v42  ;;  %v972_v46 = vadd.f32 %v940_v39, %v3272_v17  ;;  %v657_v38 = vmax.f32 %v625_v13, 0.0  ;;  %v595_v59 = vmul.f32 %v3300_v40, %v3300_v40 }
 0x23a   :  { %2375 = vtanh.f32 %v1003_v12  ;;  %v658_v9 = vmax.f32 %v626_v20, 0.0  ;;  %v691_v32 = vsub.f32 %v2824_v48, %v3300_v40  ;;  %v941_v5 = vmul.f32 0.044715, %v909_v54  ;;  %v532_v2 = vpop.xlane.xlu1 %531 }
 0x23b   :  { %v1129_v4 = vmul.f32 %v1097_v25, %v3199_v3  ;;  %v1004_v14 = vmul.f32 0.7978846, %v972_v46  ;;  %v721_v37 = vadd.f32 1e-05, %v657_v38  ;;  %v3314_v63 = vmul.f32 0.0078125, %v403_v31  ;;  %v3919_v3 = vld [vmem:[#allocation13_spill] sm:$0xff] }
 0x23c   :  { %v722_v35 = vadd.f32 1e-05, %v658_v9  ;;  %v973_v27 = vadd.f32 %v941_v5, %v3275_v58  ;;  %v810_v29 = vmul.f32 %v2893_v60, %v3153_v34  ;;  %v563_v24 = vmul.f32 0.0078125, %v530_v6 }
 0x23d   :  { %v2370_v21 = vpop.eup %2369  ;;  %2191 = vmatprep.mubr.f32.mxu1 %v1129_v4  ;;  %2377 = vtanh.f32 %v1004_v14  ;;  %v596_v10 = vmul.f32 %v3314_v63, %v3314_v63  ;;  %v692_v51 = vsub.f32 %v3919_v3, %v3314_v63  ;;  %v564_v30 = vmul.f32 0.0078125, %v532_v2 }
 0x23e   :  { %v2372_v61 = vpop.eup %2371  ;;  %v1066_v15 = vadd.f32 1.0, %v2370_v21  ;;  %2379 = vrsqrt.f32 %v721_v37  ;;  %v1005_v47 = vmul.f32 0.7978846, %v973_v27  ;;  %v3324_v45 = vadd.f32 %v2901_v19, %v810_v29 }
 0x23f   :  { %v2374_v34 = vpop.eup %2373  ;;  %v3329_v7 = vmul.f32 %v2372_v61, %v687_v44  ;;  %2381 = vrsqrt.f32 %v722_v35  ;;  %v627_v43 = vsub.f32 %v563_v24, %v595_v59  ;;  %v628_v42 = vsub.f32 %v564_v30, %v596_v10 }
 0x240   :  { %v1098_v39 = vmul.f32 0.5, %v1066_v15  ;;  %v3334_v13 = vmul.f32 %v2374_v34, %v688_v49  ;;  %2383 = vtanh.f32 %v1005_v47  ;;  %v878_v12 = vmul.f32 %v3324_v45, %v3324_v45 }
 0x241   :  { %v659_v20 = vmax.f32 %v627_v43, 0.0  ;;  %v660_v54 = vmax.f32 %v628_v42, 0.0  ;;  %v812_v41 = vmul.f32 %v2893_v60, %v3196_v53  ;;  %v813_v16 = vmul.f32 %v2893_v60, %v3220_v50 }
 0x242   :  { %v1130_v44 = vmul.f32 %v1098_v39, %v3223_v1  ;;  %v910_v31 = vmul.f32 %v878_v12, %v3324_v45  ;;  %v814_v55 = vmul.f32 %v2893_v60, %v3228_v57  ;;  %v3349_v46 = vadd.f32 %v2901_v19, %v811_v18 }
 0x243   :  { %v723_v49 = vadd.f32 1e-05, %v659_v20  ;;  %v724_v25 = vadd.f32 1e-05, %v660_v54  ;;  %v3352_v0 = vadd.f32 %v2901_v19, %v812_v41  ;;  %v3355_v1 = vadd.f32 %v2901_v19, %v813_v16 }
 0x244   :  { %v2376_v38 = vpop.eup %2375  ;;  %2192 = vmatmul.mubr.f32.gmra.mrb[12].mxu1 %v1130_v44  ;;  %v942_v53 = vmul.f32 0.044715, %v910_v31  ;;  %v3358_v59 = vadd.f32 %v2901_v19, %v814_v55  ;;  %v815_v50 = vmul.f32 %v2893_v60, %v3255_v56  ;;  %v879_v9 = vmul.f32 %v3349_v46, %v3349_v46 }
 0x245   :  { %v1067_v57 = vadd.f32 1.0, %v2376_v38  ;;  %2385 = vrsqrt.f32 %v723_v49  ;;  %v880_v5 = vmul.f32 %v3352_v0, %v3352_v0  ;;  %v881_v4 = vmul.f32 %v3355_v1, %v3355_v1 }
 0x246   :  { %v974_v6 = vadd.f32 %v942_v53, %v3324_v45  ;;  %2387 = vrsqrt.f32 %v724_v25  ;;  %v882_v14 = vmul.f32 %v3358_v59, %v3358_v59  ;;  %v911_v56 = vmul.f32 %v879_v9, %v3349_v46 }
 0x247   :  { %v2378_v37 = vpop.eup %2377  ;;  %v1099_v35 = vmul.f32 0.5, %v1067_v57  ;;  %v912_v27 = vmul.f32 %v880_v5, %v3352_v0  ;;  %v3374_v29 = vadd.f32 %v2901_v19, %v815_v50  ;;  %v913_v10 = vmul.f32 %v881_v4, %v3355_v1 }
 0x248   :  { %v2380_v24 = vpop.eup %2379  ;;  %v1068_v2 = vadd.f32 1.0, %v2378_v37  ;;  %v1006_v21 = vmul.f32 0.7978846, %v974_v6  ;;  %v914_v30 = vmul.f32 %v882_v14, %v3358_v59  ;;  %v943_v34 = vmul.f32 0.044715, %v911_v56 }
 0x249   :  { %v2382_v61 = vpop.eup %2381  ;;  %v1131_v15 = vmul.f32 %v1099_v35, %v3250_v23  ;;  %v785_v47 = vmul.f32 %v2380_v24, %v689_v52  ;;  %v944_v43 = vmul.f32 0.044715, %v912_v27  ;;  %v945_v20 = vmul.f32 0.044715, %v913_v10 }
 0x24a   :  { %v2384_v42 = vpop.eup %2383  ;;  %v1100_v39 = vmul.f32 0.5, %v1068_v2  ;;  %v786_v12 = vmul.f32 %v2382_v61, %v690_v26  ;;  %2389 = vtanh.f32 %v1006_v21  ;;  %v975_v18 = vadd.f32 %v943_v34, %v3349_v46 }
 0x24b   :  { %2194 = vmatprep.mubr.f32.mxu1 %v1131_v15  ;;  %v1069_v54 = vadd.f32 1.0, %v2384_v42  ;;  %v976_v23 = vadd.f32 %v944_v43, %v3352_v0  ;;  %v946_v41 = vmul.f32 0.044715, %v914_v30  ;;  %v977_v62 = vadd.f32 %v945_v20, %v3355_v1 }
 0x24c   :  { %v1132_v36 = vmul.f32 %v1100_v39, %v3272_v17  ;;  %v883_v52 = vmul.f32 %v3374_v29, %v3374_v29  ;;  %v816_v33 = vmul.f32 %v2893_v60, %v3269_v28  ;;  %v1007_v26 = vmul.f32 0.7978846, %v975_v18 }
 0x24d   :  { %v1101_v22 = vmul.f32 0.5, %v1069_v54  ;;  %v1008_v44 = vmul.f32 0.7978846, %v976_v23  ;;  %v978_v31 = vadd.f32 %v946_v41, %v3358_v59  ;;  %v1009_v16 = vmul.f32 0.7978846, %v977_v62 }
 0x24e   :  { %2195 = vmatmul.mubr.f32.gmra.mrb[14].mxu1 %v1132_v36  ;;  %v915_v55 = vmul.f32 %v883_v52, %v3374_v29  ;;  %v3396_v49 = vadd.f32 %v2901_v19, %v816_v33  ;;  %v817_v17 = vmul.f32 %v2893_v60, %v3295_v11  ;;  %2391 = vtanh.f32 %v1007_v26 }
 0x24f   :  { %v2386_v25 = vpop.eup %2385  ;;  %v1133_v38 = vmul.f32 %v1101_v22, %v3275_v58  ;;  %v1010_v28 = vmul.f32 0.7978846, %v978_v31  ;;  %v818_v53 = vmul.f32 %v2893_v60, %v3305_v8  ;;  %2393 = vtanh.f32 %v1008_v44 }
 0x250   :  { %v2388_v50 = vpop.eup %2387  ;;  %v3406_v57 = vmul.f32 %v2386_v25, %v691_v32  ;;  %v947_v9 = vmul.f32 0.044715, %v915_v55  ;;  %v884_v5 = vmul.f32 %v3396_v49, %v3396_v49  ;;  %2395 = vtanh.f32 %v1009_v16 }
 0x251   :  { %2197 = vmatprep.mubr.f32.mxu1 %v1133_v38  ;;  %v3413_v58 = vmul.f32 %v2388_v50, %v692_v51  ;;  %v3416_v11 = vadd.f32 %v2901_v19, %v817_v17  ;;  %v3419_v8 = vadd.f32 %v2901_v19, %v818_v53  ;;  %2397 = vtanh.f32 %v1010_v28 }
 0x252   :  { %v979_v48 = vadd.f32 %v947_v9, %v3374_v29  ;;  %v916_v40 = vmul.f32 %v884_v5, %v3396_v49  ;;  %v819_v32 = vmul.f32 %v2893_v60, %v3329_v7  ;;  %v820_v51 = vmul.f32 %v2893_v60, %v3334_v13 }
 0x253   :  { %v885_v63 = vmul.f32 %v3416_v11, %v3416_v11  ;;  %v886_v3 = vmul.f32 %v3419_v8, %v3419_v8  ;;  %v821_v6 = vmul.f32 %v2893_v60, %v785_v47  ;;  %v822_v56 = vmul.f32 %v2893_v60, %v786_v12 }
 0x254   :  { %v2390_v4 = vpop.eup %2389  ;;  %v1011_v14 = vmul.f32 0.7978846, %v979_v48  ;;  %v948_v37 = vmul.f32 0.044715, %v916_v40  ;;  %v3433_v35 = vadd.f32 %v2901_v19, %v819_v32  ;;  %v3439_v2 = vadd.f32 %v2901_v19, %v820_v51 }
 0x255   :  { %v1070_v7 = vadd.f32 1.0, %v2390_v4  ;;  %v917_v27 = vmul.f32 %v885_v63, %v3416_v11  ;;  %v918_v24 = vmul.f32 %v886_v3, %v3419_v8  ;;  %v3445_v10 = vadd.f32 %v2901_v19, %v821_v6 }
 0x256   :  { %2399 = vtanh.f32 %v1011_v14  ;;  %v980_v13 = vadd.f32 %v948_v37, %v3396_v49  ;;  %v887_v21 = vmul.f32 %v3433_v35, %v3433_v35  ;;  %v888_v47 = vmul.f32 %v3439_v2, %v3439_v2 }
 0x257   :  { %v1102_v30 = vmul.f32 0.5, %v1070_v7  ;;  %v949_v61 = vmul.f32 0.044715, %v917_v27  ;;  %v950_v15 = vmul.f32 0.044715, %v918_v24  ;;  %v889_v42 = vmul.f32 %v3445_v10, %v3445_v10 }
 0x258   :  { %v1012_v34 = vmul.f32 0.7978846, %v980_v13  ;;  %v919_v43 = vmul.f32 %v887_v21, %v3433_v35  ;;  %v3453_v39 = vadd.f32 %v2901_v19, %v822_v56  ;;  %v2392_v12 = vpop.eup %2391  ;;  %v920_v23 = vmul.f32 %v888_v47, %v3439_v2 }
 0x259   :  { %v1134_v20 = vmul.f32 %v1102_v30, %v3324_v45  ;;  %v981_v54 = vadd.f32 %v949_v61, %v3416_v11  ;;  %v982_v18 = vadd.f32 %v950_v15, %v3419_v8  ;;  %v2394_v41 = vpop.eup %2393  ;;  %v1071_v36 = vadd.f32 1.0, %v2392_v12 }
 0x25a   :  { %2401 = vtanh.f32 %v1012_v34  ;;  %v951_v62 = vmul.f32 0.044715, %v919_v43  ;;  %v921_v52 = vmul.f32 %v889_v42, %v3445_v10  ;;  %v2396_v33 = vpop.eup %2395  ;;  %v1072_v22 = vadd.f32 1.0, %v2394_v41 }
 0x25b   :  { %2198 = vmatmul.mubr.f32.gmra.mrb[16].mxu1 %v1134_v20  ;;  %v1013_v26 = vmul.f32 0.7978846, %v981_v54  ;;  %v1014_v44 = vmul.f32 0.7978846, %v982_v18  ;;  %v890_v45 = vmul.f32 %v3453_v39, %v3453_v39  ;;  %v2398_v31 = vpop.eup %2397  ;;  %v1103_v16 = vmul.f32 0.5, %v1071_v36 }
 0x25c   :  { %v1073_v55 = vadd.f32 1.0, %v2396_v33  ;;  %v983_v17 = vadd.f32 %v951_v62, %v3433_v35  ;;  %v952_v25 = vmul.f32 0.044715, %v920_v23  ;;  %v1104_v38 = vmul.f32 0.5, %v1072_v22 }
 0x25d   :  { %v1074_v28 = vadd.f32 1.0, %v2398_v31  ;;  %2403 = vtanh.f32 %v1013_v26  ;;  %v953_v53 = vmul.f32 0.044715, %v921_v52  ;;  %v1135_v50 = vmul.f32 %v1103_v16, %v3349_v46 }
 0x25e   :  { %v1105_v9 = vmul.f32 0.5, %v1073_v55  ;;  %2405 = vtanh.f32 %v1014_v44  ;;  %v1015_v5 = vmul.f32 0.7978846, %v983_v17  ;;  %v1136_v48 = vmul.f32 %v1104_v38, %v3352_v0 }
 0x25f   :  { %v1106_v40 = vmul.f32 0.5, %v1074_v28  ;;  %v984_v32 = vadd.f32 %v952_v25, %v3439_v2  ;;  %v985_v63 = vadd.f32 %v953_v53, %v3445_v10  ;;  %2200 = vmatprep.mubr.f32.mxu1 %v1135_v50  ;;  %v922_v6 = vmul.f32 %v890_v45, %v3453_v39 }
 0x260   :  { %v2400_v3 = vpop.eup %2399  ;;  %v1137_v51 = vmul.f32 %v1105_v9, %v3355_v1  ;;  %2407 = vtanh.f32 %v1015_v5  ;;  %v823_v46 = vmul.f32 %v2893_v60, %v3406_v57  ;;  %2201 = vmatmul.mubr.f32.gmra.mrb[18].mxu1 %v1136_v48  ;;  %v824_v1 = vmul.f32 %v2893_v60, %v3413_v58 }
 0x261   :  { %v1138_v4 = vmul.f32 %v1106_v40, %v3358_v59  ;;  %v1075_v14 = vadd.f32 1.0, %v2400_v3  ;;  %v1016_v0 = vmul.f32 0.7978846, %v984_v32  ;;  %v1017_v37 = vmul.f32 0.7978846, %v985_v63 }
 0x262   :  { %2203 = vmatprep.mubr.f32.mxu1 %v1137_v51  ;;  %v954_v56 = vmul.f32 0.044715, %v922_v6  ;;  %v3473_v7 = vadd.f32 %v2901_v19, %v823_v46  ;;  %v860_v13 = vadd.f32 %v2901_v19, %v824_v1 }
 0x263   :  { %v1107_v27 = vmul.f32 0.5, %v1075_v14  ;;  %2409 = vtanh.f32 %v1016_v0 }
 0x264   :  { %v2402_v24 = vpop.eup %2401  ;;  %2411 = vtanh.f32 %v1017_v37  ;;  %v986_v57 = vadd.f32 %v954_v56, %v3453_v39  ;;  %v891_v59 = vmul.f32 %v3473_v7, %v3473_v7  ;;  %2204 = vmatmul.mubr.f32.gmra.mrb[20].mxu1 %v1138_v4  ;;  %v892_v47 = vmul.f32 %v860_v13, %v860_v13 }
 0x265   :  { %v1139_v21 = vmul.f32 %v1107_v27, %v3374_v29  ;;  %v1076_v30 = vadd.f32 1.0, %v2402_v24 }
 0x266   :  { %v1018_v61 = vmul.f32 0.7978846, %v986_v57  ;;  %v923_v15 = vmul.f32 %v891_v59, %v3473_v7  ;;  %v924_v12 = vmul.f32 %v892_v47, %v860_v13 }
 0x267   :  { %v2404_v60 = vpop.eup %2403  ;;  %2206 = vmatprep.mubr.f32.mxu1 %v1139_v21  ;;  %v1108_v58 = vmul.f32 0.5, %v1076_v30 }
 0x268   :  { %v2406_v34 = vpop.eup %2405  ;;  %v1077_v43 = vadd.f32 1.0, %v2404_v60  ;;  %2413 = vtanh.f32 %v1018_v61  ;;  %v955_v42 = vmul.f32 0.044715, %v923_v15  ;;  %v956_v23 = vmul.f32 0.044715, %v924_v12 }
 0x269   :  { %v1140_v20 = vmul.f32 %v1108_v58, %v3396_v49  ;;  %v1078_v54 = vadd.f32 1.0, %v2406_v34 }
 0x26a   :  { %v2408_v19 = vpop.eup %2407  ;;  %v1109_v18 = vmul.f32 0.5, %v1077_v43  ;;  %v987_v29 = vadd.f32 %v955_v42, %v3473_v7  ;;  %v988_v33 = vadd.f32 %v956_v23, %v860_v13 }
 0x26b   :  { %2207 = vmatmul.mubr.f32.gmra.mrb[22].mxu1 %v1140_v20  ;;  %v1110_v41 = vmul.f32 0.5, %v1078_v54  ;;  %v1079_v36 = vadd.f32 1.0, %v2408_v19 }
 0x26c   :  { %v1141_v62 = vmul.f32 %v1109_v18, %v3416_v11  ;;  %v1019_v52 = vmul.f32 0.7978846, %v987_v29  ;;  %v1020_v31 = vmul.f32 0.7978846, %v988_v33 }
 0x26d   :  { %v2410_v22 = vpop.eup %2409  ;;  %v1142_v26 = vmul.f32 %v1110_v41, %v3419_v8  ;;  %v1111_v44 = vmul.f32 0.5, %v1079_v36 }
 0x26e   :  { %v2412_v45 = vpop.eup %2411  ;;  %2209 = vmatprep.mubr.f32.mxu1 %v1141_v62  ;;  %v1080_v49 = vadd.f32 1.0, %v2410_v22  ;;  %2415 = vtanh.f32 %v1019_v52 }
 0x26f   :  { %2210 = vmatmul.mubr.f32.gmra.mrb[24].mxu1 %v1142_v26  ;;  %v1143_v16 = vmul.f32 %v1111_v44, %v3433_v35  ;;  %v1081_v55 = vadd.f32 1.0, %v2412_v45  ;;  %2417 = vtanh.f32 %v1020_v31 }
 0x270   :  { %v1112_v17 = vmul.f32 0.5, %v1080_v49 }
 0x271   :  { %2212 = vmatprep.mubr.f32.mxu1 %v1143_v16  ;;  %v1113_v25 = vmul.f32 0.5, %v1081_v55 }
 0x272   :  { %v2414_v11 = vpop.eup %2413  ;;  %v1144_v38 = vmul.f32 %v1112_v17, %v3439_v2  ;;  %v3495_v2 = vld [vmem:[%s3899_s4] sm:$0x7]  ;;  %s2582_s4 = smov [#allocation8]  }
 0x273   :  { %v1145_v28 = vmul.f32 %v1113_v25, %v3445_v10  ;;  %v1082_v8 = vadd.f32 1.0, %v2414_v11  ;;  %v3920_v10 = vld [vmem:[#allocation12_spill] sm:$0xff]  ;;  %s1952_s8 = sshll.u32 %s2582_s4, 4  ;;  %s1953_s8 = int_to_ptr.vmem [resolvable:$true] %s1952_s8 }
 0x274   :  { %2213 = vmatmul.mubr.f32.gmra.mrb[26].mxu1 %v1144_v38  ;;  %v3921_v51 = vsub.s32 0, %v3920_v10  ;;  %s2549_s9 = scalar_lea.vmem %s1953_s8, 4096  ;;  %p2554_p11 = scmp.lt.s32.totalorder %s1953_s8, %s1953_s8 }
 0x275   :  { %2215 = vmatprep.mubr.f32.mxu1 %v1145_v28  ;;  %v1114_v53 = vmul.f32 0.5, %v1082_v8  ;;  %p2550_p10 = scmp.ne.s32.totalorder %s1953_s8, %s2549_s9  ;;  %p2555_p12 = scmp.lt.s32.totalorder %s2549_s9, %s2549_s9 }
 0x277   :  { %v1146_v50 = vmul.f32 %v1114_v53, %v3453_v39  ;;  %v3500_v39 = vrot.slane %v3495_v2, %v3921_v51  ;;  %p2556_p13 = por %p2555_p12, %p2554_p11 }
 0x278   :  { %v2416_v9 = vpop.eup %2415 }
 0x279   :  { %2216 = vmatmul.mubr.f32.gmra.mrb[28].mxu1 %v1146_v50  ;;  %v1083_v5 = vadd.f32 1.0, %v2416_v9  ;;  %v2418_v35 = vpop.eup %2417  ;;  %p2557_p0 = pnand %p2556_p13, %p2550_p10 }
 0x27a   :  { %v1084_v40 = vadd.f32 1.0, %v2418_v35 }
 0x27b   :  { %v1115_v48 = vmul.f32 0.5, %v1083_v5 }
 0x27c   :  { %v1116_v63 = vmul.f32 0.5, %v1084_v40 }
 0x27d   :  { %v1147_v32 = vmul.f32 %v1115_v48, %v3473_v7 }
 0x27e   :  { %v1148_v3 = vmul.f32 %v1116_v63, %v860_v13 }
 0x27f   :  { %2218 = vmatprep.mubr.f32.mxu1 %v1147_v32 }
 0x280   :  { %2219 = vmatmul.mubr.f32.gmra.mrb[30].mxu1 %v1148_v3 }
 0x2cb   :  { %v2175_v6 = vpop.f32.mrb[0].mxu1 }
 0x2cc   :  { %v3503_v46 = vadd.f32 %v2175_v6, %v3500_v39  ;;  %v1236_v4 = vpop.f32.mrb[1].mxu1 }
 0x2cd   :  { %v3506_v14 = vadd.f32 %v1236_v4, %v3500_v39 }
 0x2ce   :  { %1397 = vadd.xlane.f32.xlu1 %v3503_v46  ;;  %v1492_v0 = vmul.f32 %v3503_v46, %v3503_v46 }
 0x2cf   :  { %1395 = vadd.xlane.f32.xlu0 %v3506_v14  ;;  %v1491_v37 = vmul.f32 %v3506_v14, %v3506_v14 }
 0x2d2   :  { %1525 = vadd.xlane.f32.xlu1 %v1492_v0 }
 0x2d3   :  { %1523 = vadd.xlane.f32.xlu0 %v1491_v37 }
 0x2d5   :  { %v2178_v56 = vpop.f32.mrb[2].mxu1 }
 0x2d6   :  { %v3515_v7 = vadd.f32 %v2178_v56, %v3500_v39  ;;  %v1246_v1 = vpop.f32.mrb[3].mxu1 }
 0x2d7   :  { %v3518_v27 = vadd.f32 %v1246_v1, %v3500_v39 }
 0x2d8   :  { %1401 = vadd.xlane.f32.xlu1 %v3515_v7  ;;  %v1494_v24 = vmul.f32 %v3515_v7, %v3515_v7 }
 0x2d9   :  { %1399 = vadd.xlane.f32.xlu0 %v3518_v27  ;;  %v1493_v57 = vmul.f32 %v3518_v27, %v3518_v27 }
 0x2dc   :  { %1529 = vadd.xlane.f32.xlu1 %v1494_v24 }
 0x2dd   :  { %1527 = vadd.xlane.f32.xlu0 %v1493_v57 }
 0x2e1   :  { %v2181_v59 = vpop.f32.mrb[4].mxu1 }
 0x2e2   :  { %v3527_v13 = vadd.f32 %v2181_v59, %v3500_v39  ;;  %v1256_v21 = vpop.f32.mrb[5].mxu1 }
 0x2e3   :  { %v3530_v30 = vadd.f32 %v1256_v21, %v3500_v39 }
 0x2e4   :  { %1405 = vadd.xlane.f32.xlu1 %v3527_v13  ;;  %v1496_v61 = vmul.f32 %v3527_v13, %v3527_v13 }
 0x2e5   :  { %1403 = vadd.xlane.f32.xlu0 %v3530_v30  ;;  %v1495_v15 = vmul.f32 %v3530_v30, %v3530_v30 }
 0x2e8   :  { %1533 = vadd.xlane.f32.xlu1 %v1496_v61 }
 0x2e9   :  { %1531 = vadd.xlane.f32.xlu0 %v1495_v15 }
 0x2eb   :  { %v2184_v47 = vpop.f32.mrb[6].mxu1 }
 0x2ec   :  { %v3539_v60 = vadd.f32 %v2184_v47, %v3500_v39  ;;  %v1266_v58 = vpop.f32.mrb[7].mxu1 }
 0x2ed   :  { %v3542_v34 = vadd.f32 %v1266_v58, %v3500_v39 }
 0x2ee   :  { %1409 = vadd.xlane.f32.xlu1 %v3539_v60  ;;  %v1498_v43 = vmul.f32 %v3539_v60, %v3539_v60 }
 0x2ef   :  { %1407 = vadd.xlane.f32.xlu0 %v3542_v34  ;;  %v1497_v42 = vmul.f32 %v3542_v34, %v3542_v34 }
 0x2f2   :  { %1537 = vadd.xlane.f32.xlu1 %v1498_v43 }
 0x2f3   :  { %1535 = vadd.xlane.f32.xlu0 %v1497_v42 }
 0x2fd   :  { %v2187_v12 = vpop.f32.mrb[8].mxu1 }
 0x2fe   :  { %v3551_v20 = vadd.f32 %v2187_v12, %v3500_v39  ;;  %v1276_v54 = vpop.f32.mrb[9].mxu1 }
 0x2ff   :  { %v3554_v19 = vadd.f32 %v1276_v54, %v3500_v39 }
 0x300   :  { %1413 = vadd.xlane.f32.xlu1 %v3551_v20  ;;  %v1500_v18 = vmul.f32 %v3551_v20, %v3551_v20 }
 0x301   :  { %1411 = vadd.xlane.f32.xlu0 %v3554_v19  ;;  %v1499_v29 = vmul.f32 %v3554_v19, %v3554_v19 }
 0x304   :  { %1541 = vadd.xlane.f32.xlu1 %v1500_v18 }
 0x305   :  { %1539 = vadd.xlane.f32.xlu0 %v1499_v29 }
 0x30b   :  { %v2190_v23 = vpop.f32.mrb[10].mxu1 }
 0x30c   :  { %v3563_v41 = vadd.f32 %v2190_v23, %v3500_v39  ;;  %v1286_v36 = vpop.f32.mrb[11].mxu1 }
 0x30d   :  { %v3566_v62 = vadd.f32 %v1286_v36, %v3500_v39 }
 0x30e   :  { %1417 = vadd.xlane.f32.xlu1 %v3563_v41  ;;  %v1502_v52 = vmul.f32 %v3563_v41, %v3563_v41 }
 0x30f   :  { %1415 = vadd.xlane.f32.xlu0 %v3566_v62  ;;  %v1501_v33 = vmul.f32 %v3566_v62, %v3566_v62 }
 0x312   :  { %1545 = vadd.xlane.f32.xlu1 %v1502_v52 }
 0x313   :  { %1543 = vadd.xlane.f32.xlu0 %v1501_v33 }
 0x317   :  { %v2193_v22 = vpop.f32.mrb[12].mxu1 }
 0x318   :  { %v3575_v26 = vadd.f32 %v2193_v22, %v3500_v39  ;;  %v1296_v44 = vpop.f32.mrb[13].mxu1 }
 0x319   :  { %v3578_v45 = vadd.f32 %v1296_v44, %v3500_v39 }
 0x31a   :  { %1421 = vadd.xlane.f32.xlu1 %v3575_v26  ;;  %v1504_v49 = vmul.f32 %v3575_v26, %v3575_v26 }
 0x31b   :  { %1419 = vadd.xlane.f32.xlu0 %v3578_v45  ;;  %v1503_v31 = vmul.f32 %v3578_v45, %v3578_v45 }
 0x31e   :  { %1549 = vadd.xlane.f32.xlu1 %v1504_v49 }
 0x31f   :  { %1547 = vadd.xlane.f32.xlu0 %v1503_v31 }
 0x321   :  { %v2196_v16 = vpop.f32.mrb[14].mxu1 }
 0x322   :  { %v3587_v55 = vadd.f32 %v2196_v16, %v3500_v39  ;;  %v1306_v17 = vpop.f32.mrb[15].mxu1 }
 0x323   :  { %v3590_v25 = vadd.f32 %v1306_v17, %v3500_v39 }
 0x324   :  { %1425 = vadd.xlane.f32.xlu1 %v3587_v55  ;;  %v1506_v11 = vmul.f32 %v3587_v55, %v3587_v55 }
 0x325   :  { %1423 = vadd.xlane.f32.xlu0 %v3590_v25  ;;  %v1505_v38 = vmul.f32 %v3590_v25, %v3590_v25 }
 0x328   :  { %1553 = vadd.xlane.f32.xlu1 %v1506_v11 }
 0x329   :  { %1551 = vadd.xlane.f32.xlu0 %v1505_v38 }
 0x32e   :  { %v2199_v28 = vpop.f32.mrb[16].mxu1 }
 0x32f   :  { %v3599_v8 = vadd.f32 %v2199_v28, %v3500_v39  ;;  %v1316_v53 = vpop.f32.mrb[17].mxu1 }
 0x330   :  { %v3602_v50 = vadd.f32 %v1316_v53, %v3500_v39 }
 0x331   :  { %1429 = vadd.xlane.f32.xlu1 %v3599_v8  ;;  %v1508_v9 = vmul.f32 %v3599_v8, %v3599_v8 }
 0x332   :  { %1427 = vadd.xlane.f32.xlu0 %v3602_v50  ;;  %v1507_v35 = vmul.f32 %v3602_v50, %v3602_v50 }
 0x333   :  { %v2202_v5 = vpop.f32.mrb[18].mxu1 }
 0x334   :  { %v3611_v48 = vadd.f32 %v2202_v5, %v3500_v39  ;;  %v1326_v40 = vpop.f32.mrb[19].mxu1 }
 0x335   :  { %1557 = vadd.xlane.f32.xlu1 %v1508_v9  ;;  %v3614_v32 = vadd.f32 %v1326_v40, %v3500_v39 }
 0x336   :  { %1555 = vadd.xlane.f32.xlu0 %v1507_v35  ;;  %v1510_v51 = vmul.f32 %v3611_v48, %v3611_v48 }
 0x337   :  { %v2205_v63 = vpop.f32.mrb[20].mxu1  ;;  %v1509_v6 = vmul.f32 %v3614_v32, %v3614_v32 }
 0x338   :  { %v1336_v3 = vpop.f32.mrb[21].mxu1  ;;  %v3623_v4 = vadd.f32 %v2205_v63, %v3500_v39 }
 0x339   :  { %1433 = vadd.xlane.f32.xlu1 %v3611_v48  ;;  %v3626_v0 = vadd.f32 %v1336_v3, %v3500_v39 }
 0x33a   :  { %1431 = vadd.xlane.f32.xlu0 %v3614_v32  ;;  %v1512_v24 = vmul.f32 %v3623_v4, %v3623_v4 }
 0x33b   :  { %v1511_v59 = vmul.f32 %v3626_v0, %v3626_v0 }
 0x33d   :  { %1561 = vadd.xlane.f32.xlu1 %v1510_v51 }
 0x33e   :  { %1559 = vadd.xlane.f32.xlu0 %v1509_v6  ;;  %v2208_v37 = vpop.f32.mrb[22].mxu1 }
 0x33f   :  { %v1346_v56 = vpop.f32.mrb[23].mxu1  ;;  %v3635_v21 = vadd.f32 %v2208_v37, %v3500_v39 }
 0x340   :  { %v3638_v61 = vadd.f32 %v1346_v56, %v3500_v39 }
 0x341   :  { %1437 = vadd.xlane.f32.xlu1 %v3623_v4  ;;  %v1514_v58 = vmul.f32 %v3635_v21, %v3635_v21 }
 0x342   :  { %1435 = vadd.xlane.f32.xlu0 %v3626_v0  ;;  %v2211_v1 = vpop.f32.mrb[24].mxu1  ;;  %v1513_v43 = vmul.f32 %v3638_v61, %v3638_v61 }
 0x343   :  { %v1356_v57 = vpop.f32.mrb[25].mxu1  ;;  %v3647_v12 = vadd.f32 %v2211_v1, %v3500_v39 }
 0x344   :  { %v3650_v18 = vadd.f32 %v1356_v57, %v3500_v39 }
 0x345   :  { %1565 = vadd.xlane.f32.xlu1 %v1512_v24  ;;  %v1516_v29 = vmul.f32 %v3647_v12, %v3647_v12 }
 0x346   :  { %1563 = vadd.xlane.f32.xlu0 %v1511_v59  ;;  %v1515_v23 = vmul.f32 %v3650_v18, %v3650_v18 }
 0x347   :  { %v2214_v15 = vpop.f32.mrb[26].mxu1 }
 0x348   :  { %v1366_v47 = vpop.f32.mrb[27].mxu1  ;;  %v3659_v52 = vadd.f32 %v2214_v15, %v3500_v39 }
 0x349   :  { %1441 = vadd.xlane.f32.xlu1 %v3635_v21  ;;  %v3662_v22 = vadd.f32 %v1366_v47, %v3500_v39 }
 0x34a   :  { %1439 = vadd.xlane.f32.xlu0 %v3638_v61  ;;  %v1518_v44 = vmul.f32 %v3659_v52, %v3659_v52 }
 0x34b   :  { %v1517_v49 = vmul.f32 %v3662_v22, %v3662_v22 }
 0x34c   :  { %v2217_v42 = vpop.f32.mrb[28].mxu1 }
 0x34d   :  { %1569 = vadd.xlane.f32.xlu1 %v1514_v58  ;;  %v1376_v54 = vpop.f32.mrb[29].mxu1  ;;  %v3671_v31 = vadd.f32 %v2217_v42, %v3500_v39 }
 0x34e   :  { %1567 = vadd.xlane.f32.xlu0 %v1513_v43  ;;  %v3674_v17 = vadd.f32 %v1376_v54, %v3500_v39 }
 0x34f   :  { %v1520_v40 = vmul.f32 %v3671_v31, %v3671_v31 }
 0x350   :  { %v1519_v51 = vmul.f32 %v3674_v17, %v3674_v17 }
 0x351   :  { %1445 = vadd.xlane.f32.xlu1 %v3647_v12 }
 0x352   :  { %1443 = vadd.xlane.f32.xlu0 %v3650_v18 }
 0x353   :  { %v2220_v36 = vpop.f32.mrb[30].mxu1 }
 0x354   :  { %v1386_v33 = vpop.f32.mrb[31].mxu1  ;;  %v3683_v37 = vadd.f32 %v2220_v36, %v3500_v39 }
 0x355   :  { %1573 = vadd.xlane.f32.xlu1 %v1516_v29  ;;  %v3686_v1 = vadd.f32 %v1386_v33, %v3500_v39 }
 0x356   :  { %1571 = vadd.xlane.f32.xlu0 %v1515_v23  ;;  %v1522_v54 = vmul.f32 %v3683_v37, %v3683_v37 }
 0x357   :  { %v1521_v29 = vmul.f32 %v3686_v1, %v3686_v1 }
 0x359   :  { %1449 = vadd.xlane.f32.xlu1 %v3659_v52 }
 0x35a   :  { %1447 = vadd.xlane.f32.xlu0 %v3662_v22 }
 0x35b   :  { %v1398_v16 = vpop.xlane.xlu1 %1397 }
 0x35c   :  { %v1460_v11 = vmul.f32 0.0078125, %v1398_v16  ;;  %v1396_v38 = vpop.xlane.xlu0 %1395 }
 0x35d   :  { %1577 = vadd.xlane.f32.xlu1 %v1518_v44  ;;  %v1459_v28 = vmul.f32 0.0078125, %v1396_v38 }
 0x35e   :  { %1575 = vadd.xlane.f32.xlu0 %v1517_v49  ;;  %v1620_v9 = vmul.f32 %v1460_v11, %v1460_v11 }
 0x35f   :  { %v1526_v53 = vpop.xlane.xlu1 %1525  ;;  %v1619_v63 = vmul.f32 %v1459_v28, %v1459_v28 }
 0x360   :  { %v1588_v5 = vmul.f32 0.0078125, %v1526_v53  ;;  %v1524_v35 = vpop.xlane.xlu0 %1523 }
 0x361   :  { %1453 = vadd.xlane.f32.xlu1 %v3671_v31  ;;  %v1587_v3 = vmul.f32 0.0078125, %v1524_v35  ;;  %v3922_v35 = vsub.s32 1, %v3920_v10 }
 0x362   :  { %1451 = vadd.xlane.f32.xlu0 %v3674_v17  ;;  %v1652_v6 = vsub.f32 %v1588_v5, %v1620_v9 }
 0x363   :  { %v1651_v56 = vsub.f32 %v1587_v3, %v1619_v63  ;;  %v1716_v63 = vsub.f32 %v3503_v46, %v1460_v11 }
 0x364   :  { %v1684_v24 = vmax.f32 %v1652_v6, 0.0 }
 0x365   :  { %1581 = vadd.xlane.f32.xlu1 %v1520_v40  ;;  %v1683_v57 = vmax.f32 %v1651_v56, 0.0  ;;  %v1402_v59 = vpop.xlane.xlu1 %1401  ;;  %v3701_v40 = vrot.slane %v3495_v2, %v3922_v35  ;;  %v1715_v56 = vsub.f32 %v3506_v14, %v1459_v28 }
 0x366   :  { %1579 = vadd.xlane.f32.xlu0 %v1519_v51  ;;  %v1748_v15 = vadd.f32 1e-05, %v1684_v24  ;;  %v3688_v47 = vmul.f32 0.0078125, %v1402_v59  ;;  %v1400_v58 = vpop.xlane.xlu0 %1399 }
 0x367   :  { %v1747_v43 = vadd.f32 1e-05, %v1683_v57  ;;  %v1461_v42 = vmul.f32 0.0078125, %v1400_v58 }
 0x368   :  { %2419 = vrsqrt.f32 %v1748_v15  ;;  %v1622_v23 = vmul.f32 %v3688_v47, %v3688_v47  ;;  %v3923_v15 = vsub.s32 2, %v3920_v10 }
 0x369   :  { %1457 = vadd.xlane.f32.xlu1 %v3683_v37  ;;  %2421 = vrsqrt.f32 %v1747_v43  ;;  %v1530_v39 = vpop.xlane.xlu1 %1529  ;;  %v1621_v44 = vmul.f32 %v1461_v42, %v1461_v42 }
 0x36a   :  { %1455 = vadd.xlane.f32.xlu0 %v3686_v1  ;;  %v1590_v36 = vmul.f32 0.0078125, %v1530_v39  ;;  %v1528_v33 = vpop.xlane.xlu0 %1527  ;;  %v3710_v58 = vrot.slane %v3495_v2, %v3923_v15 }
 0x36b   :  { %v1589_v49 = vmul.f32 0.0078125, %v1528_v33 }
 0x36c   :  { %v1654_v16 = vsub.f32 %v1590_v36, %v1622_v23 }
 0x36d   :  { %1585 = vadd.xlane.f32.xlu1 %v1522_v54  ;;  %v1653_v38 = vsub.f32 %v1589_v49, %v1621_v44 }
 0x36e   :  { %1583 = vadd.xlane.f32.xlu0 %v1521_v29  ;;  %v1686_v53 = vmax.f32 %v1654_v16, 0.0 }
 0x36f   :  { %v1685_v9 = vmax.f32 %v1653_v38, 0.0 }
 0x370   :  { %v1750_v5 = vadd.f32 1e-05, %v1686_v53  ;;  %v1718_v53 = vsub.f32 %v3515_v7, %v3688_v47 }
 0x371   :  { %v1749_v3 = vadd.f32 1e-05, %v1685_v9  ;;  %v1406_v51 = vpop.xlane.xlu1 %1405 }
 0x372   :  { %v2420_v6 = vpop.eup %2419  ;;  %2423 = vrsqrt.f32 %v1750_v5  ;;  %v3705_v24 = vmul.f32 0.0078125, %v1406_v51  ;;  %v1404_v57 = vpop.xlane.xlu0 %1403 }
 0x373   :  { %v2422_v59 = vpop.eup %2421  ;;  %v1812_v43 = vmul.f32 %v2420_v6, %v1716_v63  ;;  %2425 = vrsqrt.f32 %v1749_v3  ;;  %v1463_v54 = vmul.f32 0.0078125, %v1404_v57  ;;  %v1717_v3 = vsub.f32 %v3518_v27, %v1461_v42 }
 0x374   :  { %v1811_v39 = vmul.f32 %v2422_v59, %v1715_v56  ;;  %v1624_v14 = vmul.f32 %v3705_v24, %v3705_v24 }
 0x375   :  { %v1848_v46 = vmul.f32 %v3701_v40, %v1812_v43  ;;  %v1534_v11 = vpop.xlane.xlu1 %1533  ;;  %v1623_v10 = vmul.f32 %v1463_v54, %v1463_v54 }
 0x376   :  { %v1847_v29 = vmul.f32 %v3701_v40, %v1811_v39  ;;  %v1592_v28 = vmul.f32 0.0078125, %v1534_v11  ;;  %v1532_v23 = vpop.xlane.xlu0 %1531 }
 0x377   :  { %v1884_v36 = vadd.f32 %v3710_v58, %v1848_v46  ;;  %v1591_v33 = vmul.f32 0.0078125, %v1532_v23 }
 0x378   :  { %v1883_v2 = vadd.f32 %v3710_v58, %v1847_v29  ;;  %v1656_v44 = vsub.f32 %v1592_v28, %v1624_v14 }
 0x379   :  { %1916 = vst [vmem:[#allocation8 + $0x8] sm:$0xff] %v1884_v36  ;;  %v1655_v49 = vsub.f32 %v1591_v33, %v1623_v10 }
 0x37a   :  { %1915 = vst [vmem:[#allocation8] sm:$0xff] %v1883_v2  ;;  %v1688_v16 = vmax.f32 %v1656_v44, 0.0  ;;  %v1720_v44 = vsub.f32 %v3527_v13, %v3705_v24 }
 0x37b   :  { %v1410_v38 = vpop.xlane.xlu1 %1409  ;;  %v1687_v9 = vmax.f32 %v1655_v49, 0.0 }
 0x37c   :  { %v1466_v5 = vmul.f32 0.0078125, %v1410_v38  ;;  %v1408_v35 = vpop.xlane.xlu0 %1407  ;;  %v2424_v63 = vpop.eup %2423  ;;  %v1752_v51 = vadd.f32 1e-05, %v1688_v16  ;;  %v1719_v16 = vsub.f32 %v3530_v30, %v1463_v54 }
 0x37d   :  { %v1465_v6 = vmul.f32 0.0078125, %v1408_v35  ;;  %v2426_v56 = vpop.eup %2425  ;;  %v1814_v57 = vmul.f32 %v2424_v63, %v1718_v53  ;;  %v1751_v59 = vadd.f32 1e-05, %v1687_v9 }
 0x37e   :  { %v1813_v15 = vmul.f32 %v2426_v56, %v1717_v3  ;;  %2427 = vrsqrt.f32 %v1752_v51  ;;  %v1626_v46 = vmul.f32 %v1466_v5, %v1466_v5  ;;  %v1722_v30 = vsub.f32 %v3539_v60, %v1466_v5 }
 0x37f   :  { %v1538_v43 = vpop.xlane.xlu1 %1537  ;;  %v1850_v39 = vmul.f32 %v3701_v40, %v1814_v57  ;;  %2429 = vrsqrt.f32 %v1751_v59  ;;  %v1625_v29 = vmul.f32 %v1465_v6, %v1465_v6 }
 0x380   :  { %v1594_v11 = vmul.f32 0.0078125, %v1538_v43  ;;  %v1536_v7 = vpop.xlane.xlu0 %1535  ;;  %v1849_v47 = vmul.f32 %v3701_v40, %v1813_v15  ;;  %v1721_v15 = vsub.f32 %v3542_v34, %v1465_v6 }
 0x381   :  { %v1593_v14 = vmul.f32 0.0078125, %v1536_v7  ;;  %v1886_v27 = vadd.f32 %v3710_v58, %v1850_v39 }
 0x382   :  { %v1658_v42 = vsub.f32 %v1594_v11, %v1626_v46  ;;  %v1885_v28 = vadd.f32 %v3710_v58, %v1849_v47 }
 0x383   :  { %v1657_v23 = vsub.f32 %v1593_v14, %v1625_v29  ;;  %1918 = vst [vmem:[#allocation8 + $0x18] sm:$0xff] %v1886_v27 }
 0x384   :  { %v1690_v36 = vmax.f32 %v1658_v42, 0.0  ;;  %1917 = vst [vmem:[#allocation8 + $0x10] sm:$0xff] %v1885_v28 }
 0x385   :  { %v1689_v10 = vmax.f32 %v1657_v23, 0.0 }
 0x386   :  { %v1754_v33 = vadd.f32 1e-05, %v1690_v36 }
 0x387   :  { %v1753_v2 = vadd.f32 1e-05, %v1689_v10 }
 0x388   :  { %2431 = vrsqrt.f32 %v1754_v33  ;;  %v2428_v49 = vpop.eup %2427 }
 0x389   :  { %2433 = vrsqrt.f32 %v1753_v2  ;;  %v2430_v38 = vpop.eup %2429  ;;  %v1816_v53 = vmul.f32 %v2428_v49, %v1720_v44 }
 0x38a   :  { %v1815_v9 = vmul.f32 %v2430_v38, %v1719_v16 }
 0x38b   :  { %v1852_v35 = vmul.f32 %v3701_v40, %v1816_v53 }
 0x38c   :  { %v1851_v63 = vmul.f32 %v3701_v40, %v1815_v9 }
 0x38d   :  { %v1414_v3 = vpop.xlane.xlu1 %1413  ;;  %v1888_v51 = vadd.f32 %v3710_v58, %v1852_v35 }
 0x38e   :  { %v1468_v56 = vmul.f32 0.0078125, %v1414_v3  ;;  %v1412_v57 = vpop.xlane.xlu0 %1411  ;;  %v1887_v59 = vadd.f32 %v3710_v58, %v1851_v63 }
 0x38f   :  { %v1467_v13 = vmul.f32 0.0078125, %v1412_v57  ;;  %1920 = vst [vmem:[#allocation8 + $0x28] sm:$0xff] %v1888_v51 }
 0x390   :  { %1919 = vst [vmem:[#allocation8 + $0x20] sm:$0xff] %v1887_v59  ;;  %v1628_v43 = vmul.f32 %v1468_v56, %v1468_v56  ;;  %v1724_v59 = vsub.f32 %v3551_v20, %v1468_v56 }
 0x391   :  { %v1542_v24 = vpop.xlane.xlu1 %1541  ;;  %v1627_v47 = vmul.f32 %v1467_v13, %v1467_v13 }
 0x392   :  { %v2432_v54 = vpop.eup %2431  ;;  %v1596_v39 = vmul.f32 0.0078125, %v1542_v24  ;;  %v1540_v46 = vpop.xlane.xlu0 %1539 }
 0x393   :  { %v2434_v11 = vpop.eup %2433  ;;  %v1818_v7 = vmul.f32 %v2432_v54, %v1722_v30  ;;  %v1595_v29 = vmul.f32 0.0078125, %v1540_v46  ;;  %v1723_v54 = vsub.f32 %v3554_v19, %v1467_v13 }
 0x394   :  { %v1817_v14 = vmul.f32 %v2434_v11, %v1721_v15  ;;  %v1660_v27 = vsub.f32 %v1596_v39, %v1628_v43 }
 0x395   :  { %v1854_v42 = vmul.f32 %v3701_v40, %v1818_v7  ;;  %v1659_v28 = vsub.f32 %v1595_v29, %v1627_v47 }
 0x396   :  { %v1853_v23 = vmul.f32 %v3701_v40, %v1817_v14  ;;  %v1692_v36 = vmax.f32 %v1660_v27, 0.0 }
 0x397   :  { %v1890_v60 = vadd.f32 %v3710_v58, %v1854_v42  ;;  %v1691_v5 = vmax.f32 %v1659_v28, 0.0 }
 0x398   :  { %v1889_v34 = vadd.f32 %v3710_v58, %v1853_v23  ;;  %v1756_v6 = vadd.f32 1e-05, %v1692_v36 }
 0x399   :  { %1922 = vst [vmem:[#allocation8 + $0x38] sm:$0xff] %v1890_v60  ;;  %v1755_v10 = vadd.f32 1e-05, %v1691_v5 }
 0x39a   :  { %1921 = vst [vmem:[#allocation8 + $0x30] sm:$0xff] %v1889_v34  ;;  %2435 = vrsqrt.f32 %v1756_v6 }
 0x39b   :  { %v1418_v33 = vpop.xlane.xlu1 %1417  ;;  %2437 = vrsqrt.f32 %v1755_v10 }
 0x39c   :  { %v1470_v2 = vmul.f32 0.0078125, %v1418_v33  ;;  %v1416_v44 = vpop.xlane.xlu0 %1415 }
 0x39d   :  { %v1469_v49 = vmul.f32 0.0078125, %v1416_v44 }
 0x39e   :  { %v1630_v38 = vmul.f32 %v1470_v2, %v1470_v2  ;;  %v1726_v6 = vsub.f32 %v3563_v41, %v1470_v2 }
 0x39f   :  { %v1546_v16 = vpop.xlane.xlu1 %1545  ;;  %v1629_v35 = vmul.f32 %v1469_v49, %v1469_v49  ;;  %v1725_v44 = vsub.f32 %v3566_v62, %v1469_v49 }
 0x3a0   :  { %v1598_v53 = vmul.f32 0.0078125, %v1546_v16  ;;  %v1544_v9 = vpop.xlane.xlu0 %1543 }
 0x3a1   :  { %v1597_v63 = vmul.f32 0.0078125, %v1544_v9 }
 0x3a2   :  { %v1662_v3 = vsub.f32 %v1598_v53, %v1630_v38 }
 0x3a3   :  { %v1661_v51 = vsub.f32 %v1597_v63, %v1629_v35 }
 0x3a4   :  { %v1694_v57 = vmax.f32 %v1662_v3, 0.0  ;;  %v2436_v24 = vpop.eup %2435 }
 0x3a5   :  { %v1693_v30 = vmax.f32 %v1661_v51, 0.0  ;;  %v2438_v43 = vpop.eup %2437  ;;  %v1820_v39 = vmul.f32 %v2436_v24, %v1724_v59 }
 0x3a6   :  { %v1758_v15 = vadd.f32 1e-05, %v1694_v57  ;;  %v1819_v11 = vmul.f32 %v2438_v43, %v1723_v54 }
 0x3a7   :  { %v1757_v46 = vadd.f32 1e-05, %v1693_v30  ;;  %v1422_v7 = vpop.xlane.xlu1 %1421  ;;  %v1856_v47 = vmul.f32 %v3701_v40, %v1820_v39 }
 0x3a8   :  { %2439 = vrsqrt.f32 %v1758_v15  ;;  %v1472_v29 = vmul.f32 0.0078125, %v1422_v7  ;;  %v1420_v14 = vpop.xlane.xlu0 %1419  ;;  %v1855_v27 = vmul.f32 %v3701_v40, %v1819_v11 }
 0x3a9   :  { %2441 = vrsqrt.f32 %v1757_v46  ;;  %v1471_v42 = vmul.f32 0.0078125, %v1420_v14  ;;  %v1892_v20 = vadd.f32 %v3710_v58, %v1856_v47 }
 0x3aa   :  { %v1891_v56 = vadd.f32 %v3710_v58, %v1855_v27  ;;  %v1632_v13 = vmul.f32 %v1472_v29, %v1472_v29  ;;  %v1728_v27 = vsub.f32 %v3575_v26, %v1472_v29 }
 0x3ab   :  { %v1550_v19 = vpop.xlane.xlu1 %1549  ;;  %1924 = vst [vmem:[#allocation8 + $0x48] sm:$0xff] %v1892_v20  ;;  %v1631_v36 = vmul.f32 %v1471_v42, %v1471_v42 }
 0x3ac   :  { %v1600_v28 = vmul.f32 0.0078125, %v1550_v19  ;;  %v1548_v23 = vpop.xlane.xlu0 %1547  ;;  %1923 = vst [vmem:[#allocation8 + $0x40] sm:$0xff] %v1891_v56  ;;  %v1727_v19 = vsub.f32 %v3578_v45, %v1471_v42 }
 0x3ad   :  { %v1599_v60 = vmul.f32 0.0078125, %v1548_v23 }
 0x3ae   :  { %v1664_v5 = vsub.f32 %v1600_v28, %v1632_v13 }
 0x3af   :  { %v1663_v34 = vsub.f32 %v1599_v60, %v1631_v36 }
 0x3b0   :  { %v1696_v10 = vmax.f32 %v1664_v5, 0.0 }
 0x3b1   :  { %v1695_v16 = vmax.f32 %v1663_v34, 0.0  ;;  %v1426_v38 = vpop.xlane.xlu1 %1425 }
 0x3b2   :  { %v2440_v33 = vpop.eup %2439  ;;  %v1760_v35 = vadd.f32 1e-05, %v1696_v10  ;;  %v1474_v63 = vmul.f32 0.0078125, %v1426_v38  ;;  %v1424_v3 = vpop.xlane.xlu0 %1423 }
 0x3b3   :  { %v2442_v53 = vpop.eup %2441  ;;  %v1822_v9 = vmul.f32 %v2440_v33, %v1726_v6  ;;  %v1759_v57 = vadd.f32 1e-05, %v1695_v16  ;;  %v1473_v59 = vmul.f32 0.0078125, %v1424_v3 }
 0x3b4   :  { %v1821_v51 = vmul.f32 %v2442_v53, %v1725_v44  ;;  %2443 = vrsqrt.f32 %v1760_v35  ;;  %v1634_v62 = vmul.f32 %v1474_v63, %v1474_v63  ;;  %v1730_v3 = vsub.f32 %v3587_v55, %v1474_v63 }
 0x3b5   :  { %v1858_v30 = vmul.f32 %v3701_v40, %v1822_v9  ;;  %2445 = vrsqrt.f32 %v1759_v57  ;;  %v1554_v41 = vpop.xlane.xlu1 %1553  ;;  %v1633_v43 = vmul.f32 %v1473_v59, %v1473_v59 }
 0x3b6   :  { %v1857_v24 = vmul.f32 %v3701_v40, %v1821_v51  ;;  %v1602_v49 = vmul.f32 0.0078125, %v1554_v41  ;;  %v1552_v54 = vpop.xlane.xlu0 %1551  ;;  %v1729_v41 = vsub.f32 %v3590_v25, %v1473_v59 }
 0x3b7   :  { %v1894_v2 = vadd.f32 %v3710_v58, %v1858_v30  ;;  %v1601_v39 = vmul.f32 0.0078125, %v1552_v54 }
 0x3b8   :  { %v1893_v15 = vadd.f32 %v3710_v58, %v1857_v24  ;;  %v1666_v46 = vsub.f32 %v1602_v49, %v1634_v62 }
 0x3b9   :  { %1926 = vst [vmem:[#allocation8 + $0x58] sm:$0xff] %v1894_v2  ;;  %v1665_v11 = vsub.f32 %v1601_v39, %v1633_v43 }
 0x3ba   :  { %1925 = vst [vmem:[#allocation8 + $0x50] sm:$0xff] %v1893_v15  ;;  %v1698_v7 = vmax.f32 %v1666_v46, 0.0 }
 0x3bb   :  { %v1697_v47 = vmax.f32 %v1665_v11, 0.0 }
 0x3bc   :  { %v1762_v14 = vadd.f32 1e-05, %v1698_v7 }
 0x3bd   :  { %v1761_v20 = vadd.f32 1e-05, %v1697_v47 }
 0x3be   :  { %v2444_v56 = vpop.eup %2443  ;;  %2447 = vrsqrt.f32 %v1762_v14  ;;  %v1430_v13 = vpop.xlane.xlu1 %1429 }
 0x3bf   :  { %v2446_v28 = vpop.eup %2445  ;;  %v1824_v23 = vmul.f32 %v2444_v56, %v1728_v27  ;;  %2449 = vrsqrt.f32 %v1761_v20  ;;  %v3752_v36 = vmul.f32 0.0078125, %v1430_v13  ;;  %v1428_v60 = vpop.xlane.xlu0 %1427 }
 0x3c0   :  { %v1823_v5 = vmul.f32 %v2446_v28, %v1727_v19  ;;  %v3754_v34 = vmul.f32 0.0078125, %v1428_v60 }
 0x3c1   :  { %v1860_v6 = vmul.f32 %v3701_v40, %v1824_v23  ;;  %v1636_v45 = vmul.f32 %v3752_v36, %v3752_v36 }
 0x3c2   :  { %v1859_v10 = vmul.f32 %v3701_v40, %v1823_v5  ;;  %v1558_v26 = vpop.xlane.xlu1 %1557  ;;  %v1635_v16 = vmul.f32 %v3754_v34, %v3754_v34 }
 0x3c3   :  { %v1896_v29 = vadd.f32 %v3710_v58, %v1860_v6  ;;  %v1604_v42 = vmul.f32 0.0078125, %v1558_v26  ;;  %v1556_v33 = vpop.xlane.xlu0 %1555 }
 0x3c4   :  { %v1895_v44 = vadd.f32 %v3710_v58, %v1859_v10  ;;  %v1603_v38 = vmul.f32 0.0078125, %v1556_v33  ;;  %v1732_v33 = vsub.f32 %v3599_v8, %v3752_v36 }
 0x3c5   :  { %1928 = vst [vmem:[#allocation8 + $0x68] sm:$0xff] %v1896_v29  ;;  %v1668_v53 = vsub.f32 %v1604_v42, %v1636_v45 }
 0x3c6   :  { %1927 = vst [vmem:[#allocation8 + $0x60] sm:$0xff] %v1895_v44  ;;  %v1667_v9 = vsub.f32 %v1603_v38, %v1635_v16  ;;  %v1434_v35 = vpop.xlane.xlu1 %1433 }
 0x3c7   :  { %v1700_v51 = vmax.f32 %v1668_v53, 0.0  ;;  %v3765_v57 = vmul.f32 0.0078125, %v1434_v35  ;;  %v1432_v30 = vpop.xlane.xlu0 %1431  ;;  %v1731_v53 = vsub.f32 %v3602_v50, %v3754_v34 }
 0x3c8   :  { %v2448_v24 = vpop.eup %2447  ;;  %v1699_v2 = vmax.f32 %v1667_v9, 0.0  ;;  %v3768_v62 = vmul.f32 0.0078125, %v1432_v30 }
 0x3c9   :  { %v2450_v49 = vpop.eup %2449  ;;  %v1826_v54 = vmul.f32 %v2448_v24, %v1730_v3  ;;  %v1764_v15 = vadd.f32 1e-05, %v1700_v51  ;;  %v1638_v55 = vmul.f32 %v3765_v57, %v3765_v57 }
 0x3ca   :  { %v1825_v43 = vmul.f32 %v2450_v49, %v1729_v41  ;;  %v1763_v39 = vadd.f32 1e-05, %v1699_v2  ;;  %v1562_v46 = vpop.xlane.xlu1 %1561  ;;  %v1637_v25 = vmul.f32 %v3768_v62, %v3768_v62 }
 0x3cb   :  { %v1862_v11 = vmul.f32 %v3701_v40, %v1826_v54  ;;  %2451 = vrsqrt.f32 %v1764_v15  ;;  %v1606_v63 = vmul.f32 0.0078125, %v1562_v46  ;;  %v1560_v7 = vpop.xlane.xlu0 %1559 }
 0x3cc   :  { %v1861_v47 = vmul.f32 %v3701_v40, %v1825_v43  ;;  %2453 = vrsqrt.f32 %v1763_v39  ;;  %v1605_v59 = vmul.f32 0.0078125, %v1560_v7  ;;  %v1734_v7 = vsub.f32 %v3611_v48, %v3765_v57 }
 0x3cd   :  { %v1898_v14 = vadd.f32 %v3710_v58, %v1862_v11  ;;  %v1670_v27 = vsub.f32 %v1606_v63, %v1638_v55 }
 0x3ce   :  { %v1897_v20 = vadd.f32 %v3710_v58, %v1861_v47  ;;  %v1669_v56 = vsub.f32 %v1605_v59, %v1637_v25  ;;  %v1438_v19 = vpop.xlane.xlu1 %1437 }
 0x3cf   :  { %1930 = vst [vmem:[#allocation8 + $0x78] sm:$0xff] %v1898_v14  ;;  %v1702_v13 = vmax.f32 %v1670_v27, 0.0  ;;  %v3778_v28 = vmul.f32 0.0078125, %v1438_v19  ;;  %v1436_v23 = vpop.xlane.xlu0 %1435  ;;  %v1733_v14 = vsub.f32 %v3614_v32, %v3768_v62 }
 0x3d0   :  { %1929 = vst [vmem:[#allocation8 + $0x70] sm:$0xff] %v1897_v20  ;;  %v1701_v60 = vmax.f32 %v1669_v56, 0.0  ;;  %v3780_v5 = vmul.f32 0.0078125, %v1436_v23 }
 0x3d1   :  { %v1766_v6 = vadd.f32 1e-05, %v1702_v13  ;;  %v1640_v29 = vmul.f32 %v3778_v28, %v3778_v28 }
 0x3d2   :  { %v1765_v10 = vadd.f32 1e-05, %v1701_v60  ;;  %v1566_v26 = vpop.xlane.xlu1 %1565  ;;  %v1639_v44 = vmul.f32 %v3780_v5, %v3780_v5 }
 0x3d3   :  { %2455 = vrsqrt.f32 %v1766_v6  ;;  %v1608_v45 = vmul.f32 0.0078125, %v1566_v26  ;;  %v1564_v42 = vpop.xlane.xlu0 %1563 }
 0x3d4   :  { %2457 = vrsqrt.f32 %v1765_v10  ;;  %v1607_v16 = vmul.f32 0.0078125, %v1564_v42 }
 0x3d5   :  { %v2452_v38 = vpop.eup %2451  ;;  %v1672_v9 = vsub.f32 %v1608_v45, %v1640_v29 }
 0x3d6   :  { %v2454_v35 = vpop.eup %2453  ;;  %v1828_v3 = vmul.f32 %v2452_v38, %v1732_v33  ;;  %v1671_v51 = vsub.f32 %v1607_v16, %v1639_v44  ;;  %v1442_v30 = vpop.xlane.xlu1 %1441 }
 0x3d7   :  { %v1827_v24 = vmul.f32 %v2454_v35, %v1731_v53  ;;  %v1704_v41 = vmax.f32 %v1672_v9, 0.0  ;;  %v3790_v2 = vmul.f32 0.0078125, %v1442_v30  ;;  %v1440_v49 = vpop.xlane.xlu0 %1439  ;;  %v1736_v53 = vsub.f32 %v3623_v4, %v3778_v28 }
 0x3d8   :  { %v1864_v8 = vmul.f32 %v3701_v40, %v1828_v3  ;;  %v1703_v36 = vmax.f32 %v1671_v51, 0.0  ;;  %v3793_v54 = vmul.f32 0.0078125, %v1440_v49  ;;  %v1735_v51 = vsub.f32 %v3626_v0, %v3780_v5 }
 0x3d9   :  { %v1863_v15 = vmul.f32 %v3701_v40, %v1827_v24  ;;  %v1768_v43 = vadd.f32 1e-05, %v1704_v41  ;;  %v1642_v11 = vmul.f32 %v3790_v2, %v3790_v2 }
 0x3da   :  { %v1900_v50 = vadd.f32 %v3710_v58, %v1864_v8  ;;  %v1767_v34 = vadd.f32 1e-05, %v1703_v36  ;;  %v1570_v39 = vpop.xlane.xlu1 %1569  ;;  %v1641_v47 = vmul.f32 %v3793_v54, %v3793_v54 }
 0x3db   :  { %v1899_v46 = vadd.f32 %v3710_v58, %v1863_v15  ;;  %2459 = vrsqrt.f32 %v1768_v43  ;;  %v1610_v55 = vmul.f32 0.0078125, %v1570_v39  ;;  %v1568_v63 = vpop.xlane.xlu0 %1567 }
 0x3dc   :  { %1932 = vst [vmem:[#allocation8 + $0x88] sm:$0xff] %v1900_v50  ;;  %2461 = vrsqrt.f32 %v1767_v34  ;;  %v1609_v25 = vmul.f32 0.0078125, %v1568_v63 }
 0x3dd   :  { %v2456_v59 = vpop.eup %2455  ;;  %1931 = vst [vmem:[#allocation8 + $0x80] sm:$0xff] %v1899_v46  ;;  %v1674_v27 = vsub.f32 %v1610_v55, %v1642_v11 }
 0x3de   :  { %v2458_v20 = vpop.eup %2457  ;;  %v1830_v56 = vmul.f32 %v2456_v59, %v1734_v7  ;;  %v1673_v19 = vsub.f32 %v1609_v25, %v1641_v47  ;;  %v1446_v13 = vpop.xlane.xlu1 %1445  ;;  %v1738_v25 = vsub.f32 %v3635_v21, %v3790_v2 }
 0x3df   :  { %v1829_v23 = vmul.f32 %v2458_v20, %v1733_v14  ;;  %v1706_v60 = vmax.f32 %v1674_v27, 0.0  ;;  %v3806_v6 = vmul.f32 0.0078125, %v1446_v13  ;;  %v1444_v48 = vpop.xlane.xlu0 %1443  ;;  %v1737_v20 = vsub.f32 %v3638_v61, %v3793_v54 }
 0x3e0   :  { %v1866_v57 = vmul.f32 %v3701_v40, %v1830_v56  ;;  %v1705_v10 = vmax.f32 %v1673_v19, 0.0  ;;  %v3809_v26 = vmul.f32 0.0078125, %v1444_v48 }
 0x3e1   :  { %v1865_v29 = vmul.f32 %v3701_v40, %v1829_v23  ;;  %v1770_v45 = vadd.f32 1e-05, %v1706_v60  ;;  %v1644_v44 = vmul.f32 %v3806_v6, %v3806_v6 }
 0x3e2   :  { %v1902_v32 = vadd.f32 %v3710_v58, %v1866_v57  ;;  %v1769_v62 = vadd.f32 1e-05, %v1705_v10  ;;  %v1574_v42 = vpop.xlane.xlu1 %1573  ;;  %v1643_v9 = vmul.f32 %v3809_v26, %v3809_v26 }
 0x3e3   :  { %v1901_v33 = vadd.f32 %v3710_v58, %v1865_v29  ;;  %2463 = vrsqrt.f32 %v1770_v45  ;;  %v1612_v16 = vmul.f32 0.0078125, %v1574_v42  ;;  %v1572_v38 = vpop.xlane.xlu0 %1571 }
 0x3e4   :  { %1934 = vst [vmem:[#allocation8 + $0x98] sm:$0xff] %v1902_v32  ;;  %2465 = vrsqrt.f32 %v1769_v62  ;;  %v1611_v35 = vmul.f32 0.0078125, %v1572_v38 }
 0x3e5   :  { %v2460_v3 = vpop.eup %2459  ;;  %1933 = vst [vmem:[#allocation8 + $0x90] sm:$0xff] %v1901_v33  ;;  %v1676_v30 = vsub.f32 %v1612_v16, %v1644_v44 }
 0x3e6   :  { %v2462_v24 = vpop.eup %2461  ;;  %v1832_v41 = vmul.f32 %v2460_v3, %v1736_v53  ;;  %v1675_v49 = vsub.f32 %v1611_v35, %v1643_v9  ;;  %v1450_v8 = vpop.xlane.xlu1 %1449  ;;  %v1740_v53 = vsub.f32 %v3647_v12, %v3806_v6 }
 0x3e7   :  { %v1831_v36 = vmul.f32 %v2462_v24, %v1735_v51  ;;  %v1708_v15 = vmax.f32 %v1676_v30, 0.0  ;;  %v3822_v43 = vmul.f32 0.0078125, %v1450_v8  ;;  %v1448_v4 = vpop.xlane.xlu0 %1447  ;;  %v1739_v51 = vsub.f32 %v3650_v18, %v3809_v26 }
 0x3e8   :  { %v1868_v28 = vmul.f32 %v3701_v40, %v1832_v41  ;;  %v1707_v50 = vmax.f32 %v1675_v49, 0.0  ;;  %v3825_v34 = vmul.f32 0.0078125, %v1448_v4 }
 0x3e9   :  { %v1867_v39 = vmul.f32 %v3701_v40, %v1831_v36  ;;  %v1772_v46 = vadd.f32 1e-05, %v1708_v15  ;;  %v1646_v63 = vmul.f32 %v3822_v43, %v3822_v43 }
 0x3ea   :  { %v1904_v0 = vadd.f32 %v3710_v58, %v1868_v28  ;;  %v1771_v5 = vadd.f32 1e-05, %v1707_v50  ;;  %v1578_v11 = vpop.xlane.xlu1 %1577  ;;  %v1645_v59 = vmul.f32 %v3825_v34, %v3825_v34 }
 0x3eb   :  { %v1903_v55 = vadd.f32 %v3710_v58, %v1867_v39  ;;  %2467 = vrsqrt.f32 %v1772_v46  ;;  %v1614_v7 = vmul.f32 0.0078125, %v1578_v11  ;;  %v1576_v47 = vpop.xlane.xlu0 %1575 }
 0x3ec   :  { %1936 = vst [vmem:[#allocation8 + $0xa8] sm:$0xff] %v1904_v0  ;;  %2469 = vrsqrt.f32 %v1771_v5  ;;  %v1613_v14 = vmul.f32 0.0078125, %v1576_v47 }
 0x3ed   :  { %v2464_v27 = vpop.eup %2463  ;;  %1935 = vst [vmem:[#allocation8 + $0xa0] sm:$0xff] %v1903_v55  ;;  %v1678_v56 = vsub.f32 %v1614_v7, %v1646_v63  ;;  %v1742_v7 = vsub.f32 %v3659_v52, %v3822_v43 }
 0x3ee   :  { %v2466_v19 = vpop.eup %2465  ;;  %v1834_v13 = vmul.f32 %v2464_v27, %v1738_v25  ;;  %v1677_v23 = vsub.f32 %v1613_v14, %v1645_v59  ;;  %v1454_v60 = vpop.xlane.xlu1 %1453  ;;  %v1741_v14 = vsub.f32 %v3662_v22, %v3825_v34 }
 0x3ef   :  { %v1833_v48 = vmul.f32 %v2466_v19, %v1737_v20  ;;  %v1710_v57 = vmax.f32 %v1678_v56, 0.0  ;;  %v3838_v10 = vmul.f32 0.0078125, %v1454_v60  ;;  %v1452_v21 = vpop.xlane.xlu0 %1451 }
 0x3f0   :  { %v1870_v2 = vmul.f32 %v3701_v40, %v1834_v13  ;;  %v1709_v29 = vmax.f32 %v1677_v23, 0.0  ;;  %v3841_v45 = vmul.f32 0.0078125, %v1452_v21 }
 0x3f1   :  { %v1869_v32 = vmul.f32 %v3701_v40, %v1833_v48  ;;  %v1774_v62 = vadd.f32 1e-05, %v1710_v57  ;;  %v1648_v44 = vmul.f32 %v3838_v10, %v3838_v10  ;;  %v1744_v22 = vsub.f32 %v3671_v31, %v3838_v10 }
 0x3f2   :  { %v1906_v61 = vadd.f32 %v3710_v58, %v1870_v2  ;;  %v1773_v54 = vadd.f32 1e-05, %v1709_v29  ;;  %v1582_v42 = vpop.xlane.xlu1 %1581  ;;  %v1647_v9 = vmul.f32 %v3841_v45, %v3841_v45  ;;  %v1743_v29 = vsub.f32 %v3674_v17, %v3841_v45 }
 0x3f3   :  { %v1905_v33 = vadd.f32 %v3710_v58, %v1869_v32  ;;  %2471 = vrsqrt.f32 %v1774_v62  ;;  %v1616_v16 = vmul.f32 0.0078125, %v1582_v42  ;;  %v1580_v38 = vpop.xlane.xlu0 %1579 }
 0x3f4   :  { %1938 = vst [vmem:[#allocation8 + $0xb8] sm:$0xff] %v1906_v61  ;;  %2473 = vrsqrt.f32 %v1773_v54  ;;  %v1615_v35 = vmul.f32 0.0078125, %v1580_v38 }
 0x3f5   :  { %v2468_v3 = vpop.eup %2467  ;;  %1937 = vst [vmem:[#allocation8 + $0xb0] sm:$0xff] %v1905_v33  ;;  %v1680_v30 = vsub.f32 %v1616_v16, %v1648_v44 }
 0x3f6   :  { %v2470_v24 = vpop.eup %2469  ;;  %v1836_v41 = vmul.f32 %v2468_v3, %v1740_v53  ;;  %v1679_v49 = vsub.f32 %v1615_v35, %v1647_v9  ;;  %v1458_v8 = vpop.xlane.xlu1 %1457 }
 0x3f7   :  { %v1835_v36 = vmul.f32 %v2470_v24, %v1739_v51  ;;  %v1712_v15 = vmax.f32 %v1680_v30, 0.0  ;;  %v1490_v4 = vmul.f32 0.0078125, %v1458_v8  ;;  %v1456_v28 = vpop.xlane.xlu0 %1455 }
 0x3f8   :  { %v1872_v12 = vmul.f32 %v3701_v40, %v1836_v41  ;;  %v1711_v6 = vmax.f32 %v1679_v49, 0.0  ;;  %v1489_v50 = vmul.f32 0.0078125, %v1456_v28 }
 0x3f9   :  { %v1871_v39 = vmul.f32 %v3701_v40, %v1835_v36  ;;  %v1776_v46 = vadd.f32 1e-05, %v1712_v15  ;;  %v1650_v11 = vmul.f32 %v1490_v4, %v1490_v4  ;;  %v1746_v31 = vsub.f32 %v3683_v37, %v1490_v4 }
 0x3fa   :  { %v1908_v0 = vadd.f32 %v3710_v58, %v1872_v12  ;;  %v1775_v5 = vadd.f32 1e-05, %v1711_v6  ;;  %v1586_v18 = vpop.xlane.xlu1 %1585  ;;  %v1649_v47 = vmul.f32 %v1489_v50, %v1489_v50  ;;  %v1745_v16 = vsub.f32 %v3686_v1, %v1489_v50 }
 0x3fb   :  { %v1907_v26 = vadd.f32 %v3710_v58, %v1871_v39  ;;  %2475 = vrsqrt.f32 %v1776_v46  ;;  %v1618_v55 = vmul.f32 0.0078125, %v1586_v18  ;;  %v1584_v63 = vpop.xlane.xlu0 %1583 }
 0x3fc   :  { %1940 = vst [vmem:[#allocation8 + $0xc8] sm:$0xff] %v1908_v0  ;;  %2477 = vrsqrt.f32 %v1775_v5  ;;  %v1617_v25 = vmul.f32 0.0078125, %v1584_v63 }
 0x3fd   :  { %v2472_v59 = vpop.eup %2471  ;;  %1939 = vst [vmem:[#allocation8 + $0xc0] sm:$0xff] %v1907_v26  ;;  %v1682_v27 = vsub.f32 %v1618_v55, %v1650_v11 }
 0x3fe   :  { %v2474_v20 = vpop.eup %2473  ;;  %v1838_v56 = vmul.f32 %v2472_v59, %v1742_v7  ;;  %v1681_v19 = vsub.f32 %v1617_v25, %v1649_v47 }
 0x3ff   :  { %v1837_v13 = vmul.f32 %v2474_v20, %v1741_v14  ;;  %v1714_v23 = vmax.f32 %v1682_v27, 0.0 }
 0x400   :  { %v1874_v60 = vmul.f32 %v3701_v40, %v1838_v56  ;;  %v1713_v48 = vmax.f32 %v1681_v19, 0.0 }
 0x401   :  { %v1873_v57 = vmul.f32 %v3701_v40, %v1837_v13  ;;  %v1778_v52 = vadd.f32 1e-05, %v1714_v23 }
 0x402   :  { %v1910_v43 = vadd.f32 %v3710_v58, %v1874_v60  ;;  %v1777_v21 = vadd.f32 1e-05, %v1713_v48 }
 0x403   :  { %v1909_v2 = vadd.f32 %v3710_v58, %v1873_v57  ;;  %2479 = vrsqrt.f32 %v1778_v52 }
 0x404   :  { %1942 = vst [vmem:[#allocation8 + $0xd8] sm:$0xff] %v1910_v43  ;;  %2481 = vrsqrt.f32 %v1777_v21 }
 0x405   :  { %v2476_v34 = vpop.eup %2475  ;;  %1941 = vst [vmem:[#allocation8 + $0xd0] sm:$0xff] %v1909_v2 }
 0x406   :  { %v2478_v32 = vpop.eup %2477  ;;  %v1840_v62 = vmul.f32 %v2476_v34, %v1744_v22 }
 0x407   :  { %v1839_v61 = vmul.f32 %v2478_v32, %v1743_v29 }
 0x408   :  { %v1876_v54 = vmul.f32 %v3701_v40, %v1840_v62 }
 0x409   :  { %v1875_v42 = vmul.f32 %v3701_v40, %v1839_v61 }
 0x40a   :  { %v1912_v33 = vadd.f32 %v3710_v58, %v1876_v54 }
 0x40b   :  { %v1911_v44 = vadd.f32 %v3710_v58, %v1875_v42 }
 0x40c   :  { %1944 = vst [vmem:[#allocation8 + $0xe8] sm:$0xff] %v1912_v33 }
 0x40d   :  { %v2480_v10 = vpop.eup %2479  ;;  %1943 = vst [vmem:[#allocation8 + $0xe0] sm:$0xff] %v1911_v44 }
 0x40e   :  { %v2482_v38 = vpop.eup %2481  ;;  %v1842_v17 = vmul.f32 %v2480_v10, %v1746_v31 }
 0x40f   :  { %v1841_v45 = vmul.f32 %v2482_v38, %v1745_v16 }
 0x410   :  { %v1878_v53 = vmul.f32 %v3701_v40, %v1842_v17 }
 0x411   :  { %v1877_v9 = vmul.f32 %v3701_v40, %v1841_v45 }
 0x412   :  { %v1914_v35 = vadd.f32 %v3710_v58, %v1878_v53 }
 0x413   :  { %v1913_v3 = vadd.f32 %v3710_v58, %v1877_v9 }
 0x414   :  { %1946 = vst [vmem:[#allocation8 + $0xf8] sm:$0xff] %v1914_v35 }
 0x415   :  { %1945 = vst [vmem:[#allocation8 + $0xf0] sm:$0xff] %v1913_v3 }
 0x416   :  { %2560 = shalt.err (!%p2557_p0)
}
 0x417   :  { %s2561_s12 = scalar_lea.hbm %s3900_s5, 4096 }
 0x418   :  { %p2562_p1 = scmp.ne.s32.totalorder %s3900_s5, %s2561_s12  ;;  %p2565_p2 = scmp.lt.u32.totalorder %s2561_s12, %s3900_s5 }
 0x41a   :  { %p2567_p3 = pnand %p2565_p2, %p2562_p1 }
 0x41c   :  { %2570 = shalt.err (!%p2567_p3)
}
 0x41d   :  { %1958 = dma.vmem_to_hbm [thread:$0]  %s1953_s8, 4096, %s3900_s5, [#allocation4], %s2579_s30, %s2579_s30, %s2580_s6  }
 0x41e   :  { %2575 = dma.done.wait [#allocation4], 4096  }
 0x41f   :  { %2576 = vsyncadd [#allocation4], 4294963200 }
 0x420   :  { %1962 = vsyncpa [#allocation3], 1 }
 0x421   :  { %1963 = vsyncpa [#allocation6], 1 }
 0x422   :  { %1964 = vsyncpa [#allocation4], 1 }

</bundles_post_ra>
